<compile_context>
chip_gen: v7x
topology: tpu7x:2x2x1
jax: 0.10.0
libtpu: 0.0.40
codegen_flags: <defaults>
</compile_context>

<pallas_src>
import jax
import jax.numpy as jnp
from jax.experimental import pallas as pl
from jax.experimental.pallas import tpu as pltpu


# ----------------------------------------------------------------------------
# Fused Pallas kernel: Conv1d (as matmul) + capsule squash epilogue
# ----------------------------------------------------------------------------
def _primary_caps_fused_kernel(x_ref, w_ref, b_ref, grp_ref, bcast_ref, o_ref):
    # x_ref:     (TB, P)  im2col patches for a batch tile, flat order p*L_out + l
    # w_ref:     (P, F)   kron(conv_weight_flat.T, I_Lout)     (F = Cout*L_out)
    # b_ref:     (1, F)   bias repeated L_out times (channel-major, lane-dense)
    # grp_ref:   (F, N)   0/1 capsule grouping matrix          (N = F // dim_vector)
    # bcast_ref: (N, F)   its transpose (broadcast capsule scale back to elements)
    # o_ref:     (TB, F)  squashed capsules, flat in PyTorch .view order
    x = x_ref[...]                                                          # (TB, P)

    # Conv1d for the whole (Cout, L_out) block of every row in the batch tile,
    # already in channel-major flat order.
    y = jnp.dot(x, w_ref[...], preferred_element_type=jnp.float32) + b_ref[...]   # (TB, F)

    # ---- squash epilogue (fused: y never leaves VMEM) ------------------------
    # Per-capsule sum of squares on the (otherwise idle) MXU.
    nsq = jnp.dot(y * y, grp_ref[...], preferred_element_type=jnp.float32)         # (TB, N)
    norm = jnp.sqrt(nsq)
    # Forward-only math (matches PyTorch squash).
    # TODO(synk): if this kernel is ever differentiated, switch to
    # rsqrt(nsq + eps) to avoid NaN gradients at nsq == 0.
    scale = nsq / ((1.0 + nsq) * (norm + 1e-8))                                     # (TB, N)
    # Broadcast each capsule's scale back to its dim_vector elements.
    scale_full = jnp.dot(scale, bcast_ref[...], preferred_element_type=jnp.float32)  # (TB, F)

    o_ref[...] = (scale_full * y).astype(o_ref.dtype)


# ----------------------------------------------------------------------------
# Wrapper (plain-JAX glue: padding, im2col, constant operand construction)
# ----------------------------------------------------------------------------
def primary_caps_forward(x, weight, bias, dim_vector, stride=1, padding=0):
    """PrimaryCaps forward.

    x:      (B, Cin, L)        float32  (PyTorch NCL layout)
    weight: (Cout, Cin, K)     float32  (Cout = out_channels * dim_vector)
    bias:   (Cout,)            float32
    returns (B, Cout*L_out // dim_vector, dim_vector)
    """
    B, Cin, L = x.shape
    Cout, _, K = weight.shape

    L_out = (L + 2 * padding - K) // stride + 1
    F = Cout * L_out
    D = dim_vector
    assert F % D == 0
    N = F // D

    # ---- im2col (host/XLA glue), flat feature order p*L_out + l --------------
    xp = jnp.pad(x, ((0, 0), (0, 0), (padding, padding)))
    idx = jnp.arange(L_out)[None, :] * stride + jnp.arange(K)[:, None]       # (K, L_out)
    patches = xp[:, :, idx]                                                   # (B, Cin, K, L_out)
    P = Cin * K * L_out
    x_flat = patches.reshape(B, P)                                            # p = ci*K + k

    # ---- batch tiling: TB is a multiple of 8 sublanes (or the full batch) ----
    TB = min(128, -(-B // 8) * 8)
    B_pad = -(-B // TB) * TB
    if B_pad != B:
        # Zero-padded rows squash to finite values and are sliced off below.
        x_flat = jnp.pad(x_flat, ((0, B_pad - B), (0, 0)))

    # ---- constant operands (built once per call, resident across the grid) ---
    w_flat = weight.reshape(Cout, Cin * K)                                    # (Cout, CinK)
    # w_big[p*L_out + l', c*L_out + l] = w_flat[c, p] * (l == l')
    w_big = jnp.kron(w_flat.T, jnp.eye(L_out, dtype=weight.dtype))            # (P, F)
    bias_row = jnp.repeat(bias, L_out)[None, :]                               # (1, F)
    # Capsule grouping = chunks of D in channel-major flat order == PyTorch view.
    eye_n = jnp.eye(N, dtype=x.dtype)
    grp = jnp.kron(eye_n, jnp.ones((D, 1), dtype=x.dtype))                    # (F, N)
    bcast = jnp.kron(eye_n, jnp.ones((1, D), dtype=x.dtype))                  # (N, F)

    out_flat = pl.pallas_call(
        _primary_caps_fused_kernel,
        out_shape=jax.ShapeDtypeStruct((B_pad, F), jnp.float32),
        grid_spec=pltpu.PrefetchScalarGridSpec(
            num_scalar_prefetch=0,
            grid=(B_pad // TB,),
            in_specs=[
                pl.BlockSpec((TB, P), lambda b: (b, 0)),     # per-tile patches
                pl.BlockSpec((P, F), lambda b: (0, 0)),      # resident weight
                pl.BlockSpec((1, F), lambda b: (0, 0)),      # resident bias row
                pl.BlockSpec((F, N), lambda b: (0, 0)),      # resident grouping
                pl.BlockSpec((N, F), lambda b: (0, 0)),      # resident broadcast
            ],
            out_specs=pl.BlockSpec((TB, F), lambda b: (b, 0)),
        ),
        compiler_params=pltpu.CompilerParams(
            dimension_semantics=("parallel",),
            vmem_limit_bytes=32 * 1024 * 1024,
        ),
    )(x_flat, w_big, bias_row, grp, bcast)

    # Free view: the flat order is exactly PyTorch's .view(B, -1, dim_vector).
    return out_flat[:B].reshape(B, N, D)


# ----------------------------------------------------------------------------
# Example run + correctness check vs pure-JAX reference (PyTorch math path)
# ----------------------------------------------------------------------------
if __name__ == "__main__":
    in_channels = 4
    out_channels = 8
    dim_vector = 8
    kernel_size = 3
    stride = 1
    padding = 0

    B, L = 2, 16
    Cout = out_channels * dim_vector

    key = jax.random.PRNGKey(0)
    kx, kw, kb = jax.random.split(key, 3)

    x = jax.random.normal(kx, (B, in_channels, L), dtype=jnp.float32)
    fan_in = in_channels * kernel_size
    bound = 1.0 / (fan_in ** 0.5)
    weight = jax.random.uniform(kw, (Cout, in_channels, kernel_size),
                                minval=-bound, maxval=bound, dtype=jnp.float32)
    bias = jax.random.uniform(kb, (Cout,), minval=-bound, maxval=bound,
                              dtype=jnp.float32)

    out = primary_caps_forward(x, weight, bias, dim_vector,
                               stride=stride, padding=padding)
    out = jax.block_until_ready(out)

    # Reference: same math path as PyTorch PrimaryCaps.forward.
    L_out = (L + 2 * padding - kernel_size) // stride + 1
    xp = jnp.pad(x, ((0, 0), (0, 0), (padding, padding)))
    idx = jnp.arange(L_out)[:, None] * stride + jnp.arange(kernel_size)[None, :]
    patches = xp[:, :, idx]                                            # (B, Cin, L_out, K)
    patches = jnp.transpose(patches, (0, 2, 1, 3)).reshape(B, L_out, -1)
    conv_ref = jnp.einsum("blp,cp->bcl", patches,
                          weight.reshape(Cout, -1)) + bias[None, :, None]
    caps_ref = conv_ref.reshape(B, -1, dim_vector)
    norm = jnp.linalg.norm(caps_ref, axis=-1, keepdims=True)
    ref = (norm ** 2 / (1 + norm ** 2) / (norm + 1e-8)) * caps_ref

    assert out.shape == ref.shape
    assert jnp.allclose(out, ref, atol=1e-4, rtol=1e-4), \
        float(jnp.max(jnp.abs(out - ref)))

    print("KERNEL_OK")
</pallas_src>

<mosaic_0001>
module attributes {stable_mosaic.version = 11 : i64} {
  func.func @_primary_caps_fused_kernel(%arg0: i32, %arg1: memref<8x168xf32, #tpu.memory_space<vmem>>, %arg2: memref<168x896xf32, #tpu.memory_space<vmem>>, %arg3: memref<1x896xf32, #tpu.memory_space<vmem>>, %arg4: memref<896x112xf32, #tpu.memory_space<vmem>>, %arg5: memref<112x896xf32, #tpu.memory_space<vmem>>, %arg6: memref<8x896xf32, #tpu.memory_space<vmem>>) attributes {dimension_semantics = [#tpu.dimension_semantics<parallel>], iteration_bounds = array<i64: 1>, scalar_prefetch = 0 : i64, scratch_operands = 0 : i64, tpu.core_type = #tpu.core_type<tc>, window_params = [{transform_indices = @transform_0, window_bounds = array<i64: 8, 168>}, {pipeline_mode = #tpu.pipeline_mode<synchronous>, transform_indices = @transform_1, window_bounds = array<i64: 168, 896>}, {pipeline_mode = #tpu.pipeline_mode<synchronous>, transform_indices = @transform_2, window_bounds = array<i64: 1, 896>}, {pipeline_mode = #tpu.pipeline_mode<synchronous>, transform_indices = @transform_3, window_bounds = array<i64: 896, 112>}, {pipeline_mode = #tpu.pipeline_mode<synchronous>, transform_indices = @transform_4, window_bounds = array<i64: 112, 896>}, {transform_indices = @transform_5, window_bounds = array<i64: 8, 896>}]} {
    %c0 = arith.constant 0 : index
    %c0_0 = arith.constant 0 : index
    %0 = vector.load %arg1[%c0, %c0_0] : memref<8x168xf32, #tpu.memory_space<vmem>>, vector<8x168xf32>
    %c0_1 = arith.constant 0 : index
    %c0_2 = arith.constant 0 : index
    %1 = vector.load %arg2[%c0_1, %c0_2] : memref<168x896xf32, #tpu.memory_space<vmem>>, vector<168x896xf32>
    %cst = arith.constant dense<0.000000e+00> : vector<8x896xf32>
    %2 = tpu.matmul %0, %1, %cst {dimension_numbers = #tpu.dot_dimension_numbers<[1], [0], [0], [1], [0, 0, 1, 1], [], []>} : vector<8x168xf32>, vector<168x896xf32>, vector<8x896xf32> -> vector<8x896xf32>
    %c0_3 = arith.constant 0 : index
    %c0_4 = arith.constant 0 : index
    %3 = vector.load %arg3[%c0_3, %c0_4] : memref<1x896xf32, #tpu.memory_space<vmem>>, vector<1x896xf32>
    %4 = vector.broadcast %3 : vector<1x896xf32> to vector<8x896xf32>
    %5 = arith.addf %2, %4 : vector<8x896xf32>
    %6 = arith.mulf %5, %5 : vector<8x896xf32>
    %c0_5 = arith.constant 0 : index
    %c0_6 = arith.constant 0 : index
    %7 = vector.load %arg4[%c0_5, %c0_6] : memref<896x112xf32, #tpu.memory_space<vmem>>, vector<896x112xf32>
    %cst_7 = arith.constant dense<0.000000e+00> : vector<8x112xf32>
    %8 = tpu.matmul %6, %7, %cst_7 {dimension_numbers = #tpu.dot_dimension_numbers<[1], [0], [0], [1], [0, 0, 1, 1], [], []>} : vector<8x896xf32>, vector<896x112xf32>, vector<8x112xf32> -> vector<8x112xf32>
    %9 = math.sqrt %8 : vector<8x112xf32>
    %cst_8 = arith.constant 1.000000e+00 : f32
    %10 = vector.broadcast %cst_8 : f32 to vector<8x112xf32>
    %11 = arith.addf %10, %8 : vector<8x112xf32>
    %cst_9 = arith.constant 9.99999993E-9 : f32
    %12 = vector.broadcast %cst_9 : f32 to vector<8x112xf32>
    %13 = arith.addf %9, %12 : vector<8x112xf32>
    %14 = arith.mulf %11, %13 : vector<8x112xf32>
    %15 = arith.divf %8, %14 : vector<8x112xf32>
    %c0_10 = arith.constant 0 : index
    %c0_11 = arith.constant 0 : index
    %16 = vector.load %arg5[%c0_10, %c0_11] : memref<112x896xf32, #tpu.memory_space<vmem>>, vector<112x896xf32>
    %cst_12 = arith.constant dense<0.000000e+00> : vector<8x896xf32>
    %17 = tpu.matmul %15, %16, %cst_12 {dimension_numbers = #tpu.dot_dimension_numbers<[1], [0], [0], [1], [0, 0, 1, 1], [], []>} : vector<8x112xf32>, vector<112x896xf32>, vector<8x896xf32> -> vector<8x896xf32>
    %18 = arith.mulf %17, %5 : vector<8x896xf32>
    %c0_13 = arith.constant 0 : index
    %c0_14 = arith.constant 0 : index
    %19 = vector.load %arg6[%c0_13, %c0_14] : memref<8x896xf32, #tpu.memory_space<vmem>>, vector<8x896xf32>
    tpu.vector_store %arg6[%c0_13, %c0_14], %18 {strides = array<i32>} : memref<8x896xf32, #tpu.memory_space<vmem>>, vector<8x896xf32>,
    return
  }
  func.func @transform_0(%arg0: i32) -> (i32, i32) {
    %c0_i32 = arith.constant 0 : i32
    %c0_i32_0 = arith.constant 0 : i32
    return %arg0, %c0_i32 : i32, i32
  }
  func.func @transform_1(%arg0: i32) -> (i32, i32) {
    %c0_i32 = arith.constant 0 : i32
    %c0_i32_0 = arith.constant 0 : i32
    %c0_i32_1 = arith.constant 0 : i32
    return %c0_i32, %c0_i32_0 : i32, i32
  }
  func.func @transform_2(%arg0: i32) -> (i32, i32) {
    %c0_i32 = arith.constant 0 : i32
    %c0_i32_0 = arith.constant 0 : i32
    %c0_i32_1 = arith.constant 0 : i32
    return %c0_i32, %c0_i32_0 : i32, i32
  }
  func.func @transform_3(%arg0: i32) -> (i32, i32) {
    %c0_i32 = arith.constant 0 : i32
    %c0_i32_0 = arith.constant 0 : i32
    %c0_i32_1 = arith.constant 0 : i32
    return %c0_i32, %c0_i32_0 : i32, i32
  }
  func.func @transform_4(%arg0: i32) -> (i32, i32) {
    %c0_i32 = arith.constant 0 : i32
    %c0_i32_0 = arith.constant 0 : i32
    %c0_i32_1 = arith.constant 0 : i32
    return %c0_i32, %c0_i32_0 : i32, i32
  }
  func.func @transform_5(%arg0: i32) -> (i32, i32) {
    %c0_i32 = arith.constant 0 : i32
    %c0_i32_0 = arith.constant 0 : i32
    return %arg0, %c0_i32 : i32, i32
  }
}

</mosaic_0001>

<bundles_post_ra>
// kernel: tpu_custom_call.1
= control target key start
LH: loop header
LB: loop body
LE: loop exit
PB: predicated region body
PF: predicated region fallthrough
CT: control target
= control target key end

     0   :  { %10 = vsyncpa [#allocation3], 0  ;;  %s2937_s0 = inlined_call_operand.vmem [shape: f32[8,168], index: 0, kind: input, shape index: {}]   ;;  %s2938_s1 = inlined_call_operand.vmem [shape: f32[168,896], index: 1, kind: input, shape index: {}]   ;;  %s2939_s2 = inlined_call_operand.vmem [shape: f32[1,896], index: 2, kind: input, shape index: {}]   ;;  %s2940_s3 = inlined_call_operand.vmem [shape: f32[896,112], index: 3, kind: input, shape index: {}]   ;;  %s2941_s4 = inlined_call_operand.hbm [shape: f32[112,896], index: 4, kind: input, shape index: {}]   ;;  %s2942_s5 = inlined_call_operand.hbm [shape: f32[8,896], index: 5, kind: output, shape index: {}]  }
   0x1   :  { %11 = vsyncpa [#allocation4], 0  ;;  %s1978_s18 = smov [#allocation2]   ;;  %s1930_s22 = scalar_lea.hbm %s2941_s4, 12544 }
   0x2   :  { %s25_s19 = sshll.u32 %s1978_s18, 4  ;;  %p1931_p0 = scmp.ne.s32.totalorder %s2941_s4, %s1930_s22  ;;  %s26_s19 = int_to_ptr.vmem [resolvable:$true] %s25_s19 }
   0x3   :  { %p1934_p1 = scmp.lt.u32.totalorder %s1930_s22, %s2941_s4 }
   0x5   :  { %p1936_p2 = pnand %p1934_p1, %p1931_p0 }
   0x7   :  { %1939 = shalt.err (!%p1936_p2)
}
   0x8   :  { %s1940_s27 = scalar_lea.vmem %s26_s19, 12544  ;;  %p1945_p4 = scmp.lt.s32.totalorder %s26_s19, %s26_s19 }
   0x9   :  { %p1941_p3 = scmp.ne.s32.totalorder %s26_s19, %s1940_s27  ;;  %p1946_p5 = scmp.lt.s32.totalorder %s1940_s27, %s1940_s27 }
   0xb   :  { %p1947_p6 = por %p1946_p5, %p1945_p4 }
   0xd   :  { %p1948_p7 = pnand %p1947_p6, %p1941_p3 }
   0xf   :  { %1951 = shalt.err (!%p1948_p7)
}
  0x10   :  { %s1979_s28 = smov 896   ;;  %s1980_s29 = smov 56  }
  0x11   :  { %31 = dma.hbm_to_vmem [thread:$0]  %s2941_s4, 12544, %s26_s19, [#allocation3], %s1979_s28, %s1979_s28, %s1980_s29  }
  0x12   :  { %1974 = dma.done.wait [#allocation3], 12544  }
  0x13   :  { %1975 = vsyncadd [#allocation3], 4294954752  ;;  %v38_v0 = vld [vmem:[%s2938_s1 + $0x8] sm:$0xff]  ;;  %v45_v1 = vld [vmem:[%s2938_s1 + $0x40] sm:$0xff]  ;;  %vm221_vm0 = vcmask 326656   ;;  %vm1983_vm1 = vmmov 0  }
  0x14   :  { %v40_v2 = vld [vmem:[%s2938_s1 + $0x18] sm:$0xff]  ;;  %v1544_v3 = vpack.c.bf16 %v45_v1, %v38_v0  ;;  %v47_v4 = vld [vmem:[%s2938_s1 + $0x50] sm:$0xff]  ;;  %v37_v5 = vld [vmem:[%s2938_s1] sm:$0xff]  ;;  %vm1017_vm4 = vcmask 916480  }
  0x15   :  { %v44_v6 = vld [vmem:[%s2938_s1 + $0x38] sm:$0xff]  ;;  %v1584_v7 = vpack.c.bf16 %v47_v4, %v40_v2  ;;  %v39_v9 = vld [vmem:[%s2938_s1 + $0x10] sm:$0xff]  ;;  %v46_v10 = vld [vmem:[%s2938_s1 + $0x48] sm:$0xff] }
  0x16   :  { %v1546_v8 = vpack.c.bf16 %v44_v6, %v37_v5  ;;  %v52_v11 = vld [vmem:[%s2938_s1 + $0x78] sm:$0xff]  ;;  %1545 = vmatprep.subr.bf16.mxu0 %v1544_v3  ;;  %v1586_v12 = vpack.c.bf16 %v46_v10, %v39_v9  ;;  %v59_v13 = vld [vmem:[%s2938_s1 + $0xb0] sm:$0xff]  ;;  %v54_v14 = vld [vmem:[%s2938_s1 + $0x88] sm:$0xff] }
  0x17   :  { %v61_v15 = vld [vmem:[%s2938_s1 + $0xc0] sm:$0xff]  ;;  %1585 = vmatprep.subr.bf16.mxu1 %v1584_v7  ;;  %v1548_v16 = vpack.c.bf16 %v59_v13, %v52_v11  ;;  %v51_v18 = vld [vmem:[%s2938_s1 + $0x70] sm:$0xff]  ;;  %v58_v19 = vld [vmem:[%s2938_s1 + $0xa8] sm:$0xff] }
  0x18   :  { %1547 = vmatpush1.bf16.msra.mxu0 %v1546_v8  ;;  %v1588_v17 = vpack.c.bf16 %v61_v15, %v54_v14  ;;  %v53_v20 = vld [vmem:[%s2938_s1 + $0x80] sm:$0xff]  ;;  %1587 = vmatpush1.bf16.msra.mxu1 %v1586_v12  ;;  %v1550_v21 = vpack.c.bf16 %v58_v19, %v51_v18  ;;  %v60_v22 = vld [vmem:[%s2938_s1 + $0xb8] sm:$0xff]  ;;  %v66_v23 = vld [vmem:[%s2938_s1 + $0xe8] sm:$0xff] }
  0x19   :  { %v73_v24 = vld [vmem:[%s2938_s1 + $0x120] sm:$0xff]  ;;  %1549 = vmatprep.subr.bf16.mxu0 %v1548_v16  ;;  %v1590_v25 = vpack.c.bf16 %v60_v22, %v53_v20  ;;  %v68_v27 = vld [vmem:[%s2938_s1 + $0xf8] sm:$0xff]  ;;  %v75_v28 = vld [vmem:[%s2938_s1 + $0x130] sm:$0xff] }
  0x1a   :  { %1589 = vmatprep.subr.bf16.mxu1 %v1588_v17  ;;  %v1552_v26 = vpack.c.bf16 %v73_v24, %v66_v23  ;;  %v65_v29 = vld [vmem:[%s2938_s1 + $0xe0] sm:$0xff]  ;;  %v1592_v30 = vpack.c.bf16 %v75_v28, %v68_v27  ;;  %v72_v31 = vld [vmem:[%s2938_s1 + $0x118] sm:$0xff]  ;;  %v67_v32 = vld [vmem:[%s2938_s1 + $0xf0] sm:$0xff] }
  0x1b   :  { %v74_v33 = vld [vmem:[%s2938_s1 + $0x128] sm:$0xff]  ;;  %v1554_v34 = vpack.c.bf16 %v72_v31, %v65_v29  ;;  %v80_v35 = vld [vmem:[%s2938_s1 + $0x158] sm:$0xff]  ;;  %v87_v36 = vld [vmem:[%s2938_s1 + $0x190] sm:$0xff] }
  0x1c   :  { %1551 = vmatpush1.bf16.msra.mxu0 %v1550_v21  ;;  %v82_v37 = vld [vmem:[%s2938_s1 + $0x168] sm:$0xff]  ;;  %1591 = vmatpush1.bf16.msra.mxu1 %v1590_v25  ;;  %v1594_v38 = vpack.c.bf16 %v74_v33, %v67_v32  ;;  %v1556_v39 = vpack.c.bf16 %v87_v36, %v80_v35  ;;  %v89_v40 = vld [vmem:[%s2938_s1 + $0x1a0] sm:$0xff]  ;;  %v79_v41 = vld [vmem:[%s2938_s1 + $0x150] sm:$0xff] }
  0x1d   :  { %1553 = vmatprep.subr.bf16.mxu0 %v1552_v26  ;;  %v86_v42 = vld [vmem:[%s2938_s1 + $0x188] sm:$0xff]  ;;  %1593 = vmatprep.subr.bf16.mxu1 %v1592_v30  ;;  %v1596_v43 = vpack.c.bf16 %v89_v40, %v82_v37  ;;  %v81_v44 = vld [vmem:[%s2938_s1 + $0x160] sm:$0xff]  ;;  %v88_v45 = vld [vmem:[%s2938_s1 + $0x198] sm:$0xff] }
  0x1e   :  { %v94_v46 = vld [vmem:[%s2938_s1 + $0x1c8] sm:$0xff]  ;;  %v101_v47 = vld [vmem:[%s2938_s1 + $0x200] sm:$0xff]  ;;  %v96_v48 = vld [vmem:[%s2938_s1 + $0x1d8] sm:$0xff]  ;;  %v1558_v50 = vpack.c.bf16 %v86_v42, %v79_v41  ;;  %v1598_v51 = vpack.c.bf16 %v88_v45, %v81_v44 }
  0x1f   :  { %v103_v49 = vld [vmem:[%s2938_s1 + $0x210] sm:$0xff]  ;;  %v1560_v52 = vpack.c.bf16 %v101_v47, %v94_v46  ;;  %v93_v53 = vld [vmem:[%s2938_s1 + $0x1c0] sm:$0xff]  ;;  %v100_v54 = vld [vmem:[%s2938_s1 + $0x1f8] sm:$0xff] }
  0x20   :  { %1555 = vmatpush1.bf16.msra.mxu0 %v1554_v34  ;;  %1595 = vmatpush1.bf16.msra.mxu1 %v1594_v38  ;;  %v95_v55 = vld [vmem:[%s2938_s1 + $0x1d0] sm:$0xff]  ;;  %v1600_v56 = vpack.c.bf16 %v103_v49, %v96_v48  ;;  %v102_v57 = vld [vmem:[%s2938_s1 + $0x208] sm:$0xff]  ;;  %v108_v58 = vld [vmem:[%s2938_s1 + $0x238] sm:$0xff]  ;;  %v1562_v62 = vpack.c.bf16 %v100_v54, %v93_v53 }
  0x21   :  { %1557 = vmatprep.subr.bf16.mxu0 %v1556_v39  ;;  %1597 = vmatprep.subr.bf16.mxu1 %v1596_v43  ;;  %v115_v59 = vld [vmem:[%s2938_s1 + $0x270] sm:$0xff]  ;;  %v110_v60 = vld [vmem:[%s2938_s1 + $0x248] sm:$0xff]  ;;  %v117_v61 = vld [vmem:[%s2938_s1 + $0x280] sm:$0xff]  ;;  %v1602_v63 = vpack.c.bf16 %v102_v57, %v95_v55 }
  0x22   :  { %v1564_v0 = vpack.c.bf16 %v115_v59, %v108_v58  ;;  %v107_v1 = vld [vmem:[%s2938_s1 + $0x230] sm:$0xff]  ;;  %v114_v2 = vld [vmem:[%s2938_s1 + $0x268] sm:$0xff]  ;;  %v109_v3 = vld [vmem:[%s2938_s1 + $0x240] sm:$0xff]  ;;  %v1604_v4 = vpack.c.bf16 %v117_v61, %v110_v60 }
  0x23   :  { %v116_v5 = vld [vmem:[%s2938_s1 + $0x278] sm:$0xff]  ;;  %v122_v6 = vld [vmem:[%s2938_s1 + $0x2a8] sm:$0xff]  ;;  %v129_v7 = vld [vmem:[%s2938_s1 + $0x2e0] sm:$0xff]  ;;  %v1566_v10 = vpack.c.bf16 %v114_v2, %v107_v1 }
  0x24   :  { %1559 = vmatpush1.bf16.msra.mxu0 %v1558_v50  ;;  %1599 = vmatpush1.bf16.msra.mxu1 %v1598_v51  ;;  %v124_v8 = vld [vmem:[%s2938_s1 + $0x2b8] sm:$0xff]  ;;  %v131_v9 = vld [vmem:[%s2938_s1 + $0x2f0] sm:$0xff]  ;;  %v1606_v11 = vpack.c.bf16 %v116_v5, %v109_v3  ;;  %v1568_v12 = vpack.c.bf16 %v129_v7, %v122_v6  ;;  %v121_v13 = vld [vmem:[%s2938_s1 + $0x2a0] sm:$0xff] }
  0x25   :  { %1561 = vmatprep.subr.bf16.mxu0 %v1560_v52  ;;  %1601 = vmatprep.subr.bf16.mxu1 %v1600_v56  ;;  %v128_v14 = vld [vmem:[%s2938_s1 + $0x2d8] sm:$0xff]  ;;  %v123_v15 = vld [vmem:[%s2938_s1 + $0x2b0] sm:$0xff]  ;;  %v1608_v16 = vpack.c.bf16 %v131_v9, %v124_v8  ;;  %v130_v17 = vld [vmem:[%s2938_s1 + $0x2e8] sm:$0xff] }
  0x26   :  { %v136_v18 = vld [vmem:[%s2938_s1 + $0x318] sm:$0xff]  ;;  %v143_v19 = vld [vmem:[%s2938_s1 + $0x350] sm:$0xff]  ;;  %v138_v20 = vld [vmem:[%s2938_s1 + $0x328] sm:$0xff]  ;;  %v1570_v22 = vpack.c.bf16 %v128_v14, %v121_v13  ;;  %v1610_v23 = vpack.c.bf16 %v130_v17, %v123_v15  ;;  %v1981_v17 = vmov 0.0|0.0  }
  0x27   :  { %v145_v21 = vld [vmem:[%s2938_s1 + $0x360] sm:$0xff]  ;;  %v1572_v24 = vpack.c.bf16 %v143_v19, %v136_v18  ;;  %v135_v25 = vld [vmem:[%s2938_s1 + $0x310] sm:$0xff]  ;;  %v142_v26 = vld [vmem:[%s2938_s1 + $0x348] sm:$0xff] }
  0x28   :  { %1563 = vmatpush1.bf16.msra.mxu0 %v1562_v62  ;;  %1603 = vmatpush1.bf16.msra.mxu1 %v1602_v63  ;;  %v137_v27 = vld [vmem:[%s2938_s1 + $0x320] sm:$0xff]  ;;  %v1612_v28 = vpack.c.bf16 %v145_v21, %v138_v20  ;;  %v144_v29 = vld [vmem:[%s2938_s1 + $0x358] sm:$0xff]  ;;  %v150_v30 = vld [vmem:[%s2938_s1 + $0x388] sm:$0xff]  ;;  %v1574_v35 = vpack.c.bf16 %v142_v26, %v135_v25 }
  0x29   :  { %1565 = vmatprep.subr.bf16.mxu0 %v1564_v0  ;;  %1605 = vmatprep.subr.bf16.mxu1 %v1604_v4  ;;  %v157_v31 = vld [vmem:[%s2938_s1 + $0x3c0] sm:$0xff]  ;;  %v152_v32 = vld [vmem:[%s2938_s1 + $0x398] sm:$0xff]  ;;  %v159_v33 = vld [vmem:[%s2938_s1 + $0x3d0] sm:$0xff]  ;;  %v1614_v36 = vpack.c.bf16 %v144_v29, %v137_v27 }
  0x2a   :  { %v2234_v34 = vld [vmem:[%s2937_s0 + $0x8] sm:$0xff]  ;;  %v1576_v37 = vpack.c.bf16 %v157_v31, %v150_v30  ;;  %v149_v38 = vld [vmem:[%s2938_s1 + $0x380] sm:$0xff]  ;;  %v156_v39 = vld [vmem:[%s2938_s1 + $0x3b8] sm:$0xff]  ;;  %v1616_v41 = vpack.c.bf16 %v159_v33, %v152_v32 }
  0x2b   :  { %1333 = vmatprep.mubr.msk.f32.mxu0 %vm221_vm0, %v2234_v34  ;;  %v151_v40 = vld [vmem:[%s2938_s1 + $0x390] sm:$0xff]  ;;  %v158_v42 = vld [vmem:[%s2938_s1 + $0x3c8] sm:$0xff]  ;;  %v164_v43 = vld [vmem:[%s2938_s1 + $0x3f8] sm:$0xff]  ;;  %1334 = vmatprep.mubr.msk.f32.mxu1 %vm221_vm0, %v2234_v34  ;;  %v1578_v47 = vpack.c.bf16 %v156_v39, %v149_v38 }
  0x2c   :  { %1567 = vmatpush1.bf16.msra.mxu0 %v1566_v10  ;;  %1607 = vmatpush1.bf16.msra.mxu1 %v1606_v11  ;;  %v171_v44 = vld [vmem:[%s2938_s1 + $0x430] sm:$0xff]  ;;  %v166_v45 = vld [vmem:[%s2938_s1 + $0x408] sm:$0xff]  ;;  %v173_v46 = vld [vmem:[%s2938_s1 + $0x440] sm:$0xff]  ;;  %v1618_v48 = vpack.c.bf16 %v158_v42, %v151_v40 }
  0x2d   :  { %1569 = vmatprep.subr.bf16.mxu0 %v1568_v12  ;;  %1609 = vmatprep.subr.bf16.mxu1 %v1608_v16  ;;  %v1580_v49 = vpack.c.bf16 %v171_v44, %v164_v43  ;;  %v163_v50 = vld [vmem:[%s2938_s1 + $0x3f0] sm:$0xff]  ;;  %v170_v51 = vld [vmem:[%s2938_s1 + $0x428] sm:$0xff]  ;;  %v1620_v52 = vpack.c.bf16 %v173_v46, %v166_v45  ;;  %v165_v53 = vld [vmem:[%s2938_s1 + $0x400] sm:$0xff] }
  0x2e   :  { %v172_v54 = vld [vmem:[%s2938_s1 + $0x438] sm:$0xff]  ;;  %v1582_v55 = vpack.c.bf16 %v170_v51, %v163_v50  ;;  %v178_v57 = vld [vmem:[%s2938_s1 + $0x468] sm:$0xff]  ;;  %v177_v59 = vld [vmem:[%s2938_s1 + $0x460] sm:$0xff] }
  0x2f   :  { %v1622_v56 = vpack.c.bf16 %v172_v54, %v165_v53  ;;  %v180_v58 = vld [vmem:[%s2938_s1 + $0x478] sm:$0xff]  ;;  %v42_v60 = vld [vmem:[%s2938_s1 + $0x28] sm:$0xff]  ;;  %v49_v61 = vld [vmem:[%s2938_s1 + $0x60] sm:$0xff] }
  0x30   :  { %1571 = vmatpush1.bf16.msra.mxu0 %v1570_v22  ;;  %1611 = vmatpush1.bf16.msra.mxu1 %v1610_v23  ;;  %v41_v62 = vld [vmem:[%s2938_s1 + $0x20] sm:$0xff]  ;;  %v48_v63 = vld [vmem:[%s2938_s1 + $0x58] sm:$0xff]  ;;  %v63_v1 = vld [vmem:[%s2938_s1 + $0xd0] sm:$0xff]  ;;  %v1624_v6 = vpack.c.bf16 %v49_v61, %v42_v60 }
  0x31   :  { %1573 = vmatprep.subr.bf16.mxu0 %v1572_v24  ;;  %1613 = vmatprep.subr.bf16.mxu1 %v1612_v28  ;;  %v56_v0 = vld [vmem:[%s2938_s1 + $0x98] sm:$0xff]  ;;  %v43_v2 = vld [vmem:[%s2938_s1 + $0x30] sm:$0xff]  ;;  %v50_v3 = vld [vmem:[%s2938_s1 + $0x68] sm:$0xff]  ;;  %v1626_v7 = vpack.c.bf16 %v48_v63, %v41_v62 }
  0x32   :  { %v179_v4 = vld [vmem:[%s2938_s1 + $0x470] sm:$0xff]  ;;  %v2315_v5 = vld [vmem:[%s2937_s0] sm:$0xff]  ;;  %v1628_v8 = vpack.c.bf16 %v63_v1, %v56_v0  ;;  %v62_v10 = vld [vmem:[%s2938_s1 + $0xc8] sm:$0xff]  ;;  %v1665_v11 = vpack.c.bf16 %v50_v3, %v43_v2 }
  0x33   :  { %v55_v9 = vld [vmem:[%s2938_s1 + $0x90] sm:$0xff]  ;;  %v70_v12 = vld [vmem:[%s2938_s1 + $0x108] sm:$0xff]  ;;  %v77_v13 = vld [vmem:[%s2938_s1 + $0x140] sm:$0xff] }
  0x34   :  { %1575 = vmatpush1.bf16.msra.mxu0 %v1574_v35  ;;  %1615 = vmatpush1.bf16.msra.mxu1 %v1614_v36  ;;  %v57_v14 = vld [vmem:[%s2938_s1 + $0xa0] sm:$0xff]  ;;  %v64_v15 = vld [vmem:[%s2938_s1 + $0xd8] sm:$0xff]  ;;  %v1630_v16 = vpack.c.bf16 %v62_v10, %v55_v9  ;;  %v1632_v18 = vpack.c.bf16 %v77_v13, %v70_v12  ;;  %v91_v23 = vld [vmem:[%s2938_s1 + $0x1b0] sm:$0xff] }
  0x35   :  { %1577 = vmatprep.subr.bf16.mxu0 %v1576_v37  ;;  %1617 = vmatprep.subr.bf16.mxu1 %v1616_v41  ;;  %v69_v19 = vld [vmem:[%s2938_s1 + $0x100] sm:$0xff]  ;;  %v76_v20 = vld [vmem:[%s2938_s1 + $0x138] sm:$0xff]  ;;  %v1668_v21 = vpack.c.bf16 %v64_v15, %v57_v14  ;;  %v71_v24 = vld [vmem:[%s2938_s1 + $0x110] sm:$0xff] }
  0x36   :  { %v84_v22 = vld [vmem:[%s2938_s1 + $0x178] sm:$0xff]  ;;  %v78_v25 = vld [vmem:[%s2938_s1 + $0x148] sm:$0xff]  ;;  %v1634_v26 = vpack.c.bf16 %v76_v20, %v69_v19  ;;  %v83_v28 = vld [vmem:[%s2938_s1 + $0x170] sm:$0xff] }
  0x37   :  { %v1636_v27 = vpack.c.bf16 %v91_v23, %v84_v22  ;;  %v90_v29 = vld [vmem:[%s2938_s1 + $0x1a8] sm:$0xff]  ;;  %v1671_v30 = vpack.c.bf16 %v78_v25, %v71_v24  ;;  %v105_v32 = vld [vmem:[%s2938_s1 + $0x220] sm:$0xff]  ;;  %v104_v38 = vld [vmem:[%s2938_s1 + $0x218] sm:$0xff] }
  0x38   :  { %1579 = vmatpush1.bf16.msra.mxu0 %v1578_v47  ;;  %1619 = vmatpush1.bf16.msra.mxu1 %v1618_v48  ;;  %v98_v31 = vld [vmem:[%s2938_s1 + $0x1e8] sm:$0xff]  ;;  %v85_v33 = vld [vmem:[%s2938_s1 + $0x180] sm:$0xff]  ;;  %v1638_v35 = vpack.c.bf16 %v90_v29, %v83_v28  ;;  %v112_v40 = vld [vmem:[%s2938_s1 + $0x258] sm:$0xff] }
  0x39   :  { %1581 = vmatprep.subr.bf16.mxu0 %v1580_v49  ;;  %1621 = vmatprep.subr.bf16.mxu1 %v1620_v52  ;;  %v1640_v36 = vpack.c.bf16 %v105_v32, %v98_v31  ;;  %v97_v37 = vld [vmem:[%s2938_s1 + $0x1e0] sm:$0xff]  ;;  %v119_v41 = vld [vmem:[%s2938_s1 + $0x290] sm:$0xff]  ;;  %v106_v43 = vld [vmem:[%s2938_s1 + $0x228] sm:$0xff] }
  0x3a   :  { %v99_v42 = vld [vmem:[%s2938_s1 + $0x1f0] sm:$0xff]  ;;  %v1642_v44 = vpack.c.bf16 %v104_v38, %v97_v37  ;;  %v1644_v45 = vpack.c.bf16 %v119_v41, %v112_v40  ;;  %v118_v47 = vld [vmem:[%s2938_s1 + $0x288] sm:$0xff]  ;;  %v133_v50 = vld [vmem:[%s2938_s1 + $0x300] sm:$0xff] }
  0x3b   :  { %v111_v46 = vld [vmem:[%s2938_s1 + $0x250] sm:$0xff]  ;;  %v1677_v48 = vpack.c.bf16 %v106_v43, %v99_v42  ;;  %v126_v49 = vld [vmem:[%s2938_s1 + $0x2c8] sm:$0xff]  ;;  %v113_v51 = vld [vmem:[%s2938_s1 + $0x260] sm:$0xff] }
  0x3c   :  { %1583 = vmatpush1.bf16.msra.mxu0 %v1582_v55  ;;  %1623 = vmatpush1.bf16.msra.mxu1 %v1622_v56  ;;  %v120_v52 = vld [vmem:[%s2938_s1 + $0x298] sm:$0xff]  ;;  %v1646_v53 = vpack.c.bf16 %v118_v47, %v111_v46  ;;  %v1648_v54 = vpack.c.bf16 %v133_v50, %v126_v49  ;;  %v125_v55 = vld [vmem:[%s2938_s1 + $0x2c0] sm:$0xff]  ;;  %v127_v60 = vld [vmem:[%s2938_s1 + $0x2d0] sm:$0xff] }
  0x3d   :  { %265 = vmatprep.subr.mxu0 %v178_v57  ;;  %336 = vmatprep.subr.mxu1 %v180_v58  ;;  %v132_v56 = vld [vmem:[%s2938_s1 + $0x2f8] sm:$0xff]  ;;  %v1680_v57 = vpack.c.bf16 %v120_v52, %v113_v51  ;;  %v134_v61 = vld [vmem:[%s2938_s1 + $0x308] sm:$0xff]  ;;  %v139_v0 = vld [vmem:[%s2938_s1 + $0x330] sm:$0xff] }
  0x3e   :  { %v140_v58 = vld [vmem:[%s2938_s1 + $0x338] sm:$0xff]  ;;  %v1650_v62 = vpack.c.bf16 %v132_v56, %v125_v55  ;;  %v146_v1 = vld [vmem:[%s2938_s1 + $0x368] sm:$0xff]  ;;  %v1683_v2 = vpack.c.bf16 %v134_v61, %v127_v60  ;;  %v153_v10 = vld [vmem:[%s2938_s1 + $0x3a0] sm:$0xff] }
  0x3f   :  { %v154_v3 = vld [vmem:[%s2938_s1 + $0x3a8] sm:$0xff]  ;;  %v168_v13 = vld [vmem:[%s2938_s1 + $0x418] sm:$0xff]  ;;  %v175_v14 = vld [vmem:[%s2938_s1 + $0x450] sm:$0xff] }
  0x40   :  { %266 = vmatpush1.msra.mxu0 %v177_v59  ;;  %337 = vmatpush1.msra.mxu1 %v179_v4  ;;  %v147_v59 = vld [vmem:[%s2938_s1 + $0x370] sm:$0xff]  ;;  %v161_v4 = vld [vmem:[%s2938_s1 + $0x3e0] sm:$0xff]  ;;  %v1660_v19 = vpack.c.bf16 %v175_v14, %v168_v13  ;;  %v176_v24 = vld [vmem:[%s2938_s1 + $0x458] sm:$0xff] }
  0x41   :  { %290 = vmatmul.mubr.f32.vlgmr.msra.gmra.mrb[0].mxu0 %v2315_v5  ;;  %361 = vmatmul.mubr.f32.vlgmr.msra.gmra.mrb[0].mxu1 %v2315_v5  ;;  %v1652_v63 = vpack.c.bf16 %v147_v59, %v140_v58  ;;  %v1656_v9 = vpack.c.bf16 %v161_v4, %v154_v3  ;;  %v155_v15 = vld [vmem:[%s2938_s1 + $0x3b0] sm:$0xff]  ;;  %v169_v23 = vld [vmem:[%s2938_s1 + $0x420] sm:$0xff]  ;;  %v564_v32 = vld [vmem:[%s2940_s3 + $0x188] sm:$0xff] }
  0x42   :  { %1625 = vmatprep.subr.bf16.mxu0 %v1624_v6  ;;  %1664 = vmatprep.subr.bf16.mxu1 %v1981_v17  ;;  %v141_v6 = vld [vmem:[%s2938_s1 + $0x340] sm:$0xff]  ;;  %v167_v20 = vld [vmem:[%s2938_s1 + $0x410] sm:$0xff]  ;;  %v534_v38 = vld [vmem:[%s2940_s3 + $0x98] sm:$0xff] }
  0x43   :  { %1627 = vmatpush1.bf16.msra.mxu0 %v1626_v7  ;;  %1666 = vmatpush1.bf16.msra.mxu1 %v1665_v11  ;;  %v148_v7 = vld [vmem:[%s2938_s1 + $0x378] sm:$0xff]  ;;  %v531_v28 = vld [vmem:[%s2940_s3 + $0x80] sm:$0xff]  ;;  %v533_v37 = vld [vmem:[%s2940_s3 + $0x90] sm:$0xff] }
  0x44   :  { %1629 = vmatprep.subr.bf16.mxu0 %v1628_v8  ;;  %1667 = vmatprep.subr.bf16.mxu1 %v1981_v17  ;;  %v1654_v8 = vpack.c.bf16 %v146_v1, %v139_v0  ;;  %v160_v11 = vld [vmem:[%s2938_s1 + $0x3d8] sm:$0xff]  ;;  %v1686_v12 = vpack.c.bf16 %v148_v7, %v141_v6  ;;  %v181_v29 = vld [vmem:[%s2938_s1 + $0x480] sm:$0xff]  ;;  %v183_v40 = vld [vmem:[%s2938_s1 + $0x490] sm:$0xff]  ;;  %v1698_v47 = vpack.c.bf16 %v534_v38, %v533_v37 }
  0x45   :  { %1335 = vmatprep.mubr.msk.f32.mxu0 %vm221_vm0, %v2234_v34  ;;  %1336 = vmatprep.mubr.msk.f32.mxu1 %vm221_vm0, %v2234_v34  ;;  %v92_v34 = vld [vmem:[%s2938_s1 + $0x1b8] sm:$0xff]  ;;  %v563_v31 = vld [vmem:[%s2940_s3 + $0x180] sm:$0xff]  ;;  %v565_v42 = vld [vmem:[%s2940_s3 + $0x190] sm:$0xff] }
  0x46   :  { %v1674_v39 = vpack.c.bf16 %v92_v34, %v85_v33  ;;  %v515_v33 = vld [vmem:[%s2940_s3] sm:$0xff]  ;;  %v516_v34 = vld [vmem:[%s2940_s3 + $0x8] sm:$0xff]  ;;  %v566_v43 = vld [vmem:[%s2940_s3 + $0x198] sm:$0xff] }
  0x47   :  { %1631 = vmatpush1.bf16.msra.mxu0 %v1630_v16  ;;  %1669 = vmatpush1.bf16.msra.mxu1 %v1668_v21  ;;  %v162_v16 = vld [vmem:[%s2938_s1 + $0x3e8] sm:$0xff]  ;;  %v518_v49 = vld [vmem:[%s2940_s3 + $0x18] sm:$0xff]  ;;  %v549_v50 = vld [vmem:[%s2940_s3 + $0x110] sm:$0xff]  ;;  %v1730_v51 = vpack.c.bf16 %v566_v43, %v565_v42 }
  0x48   :  { %1633 = vmatprep.subr.bf16.mxu0 %v1632_v18  ;;  %1670 = vmatprep.subr.bf16.mxu1 %v1981_v17  ;;  %v1658_v18 = vpack.c.bf16 %v160_v11, %v153_v10  ;;  %v174_v21 = vld [vmem:[%s2938_s1 + $0x448] sm:$0xff]  ;;  %v1689_v22 = vpack.c.bf16 %v162_v16, %v155_v15  ;;  %v550_v52 = vld [vmem:[%s2940_s3 + $0x118] sm:$0xff]  ;;  %v567_v55 = vld [vmem:[%s2940_s3 + $0x1a0] sm:$0xff] }
  0x49   :  { %v1662_v25 = vpack.c.bf16 %v174_v21, %v167_v20  ;;  %v568_v56 = vld [vmem:[%s2940_s3 + $0x1a8] sm:$0xff]  ;;  %v1732_v58 = vpack.c.bf16 %v550_v52, %v549_v50  ;;  %v551_v61 = vld [vmem:[%s2940_s3 + $0x120] sm:$0xff]  ;;  %v537_v0 = vld [vmem:[%s2940_s3 + $0xb0] sm:$0xff] }
  0x4a   :  { %v520_v60 = vld [vmem:[%s2940_s3 + $0x28] sm:$0xff]  ;;  %v538_v1 = vld [vmem:[%s2940_s3 + $0xb8] sm:$0xff]  ;;  %v553_v10 = vld [vmem:[%s2940_s3 + $0x130] sm:$0xff] }
  0x4b   :  { %1635 = vmatpush1.bf16.msra.mxu0 %v1634_v26  ;;  %1672 = vmatpush1.bf16.msra.mxu1 %v1671_v30  ;;  %v1692_v26 = vpack.c.bf16 %v176_v24, %v169_v23  ;;  %v532_v30 = vld [vmem:[%s2940_s3 + $0x88] sm:$0xff]  ;;  %v570_v3 = vld [vmem:[%s2940_s3 + $0x1b8] sm:$0xff]  ;;  %v1706_v7 = vpack.c.bf16 %v538_v1, %v537_v0  ;;  %v539_v13 = vld [vmem:[%s2940_s3 + $0xc0] sm:$0xff] }
  0x4c   :  { %1637 = vmatprep.subr.bf16.mxu0 %v1636_v27  ;;  %1673 = vmatprep.subr.bf16.mxu1 %v1981_v17  ;;  %v182_v27 = vld [vmem:[%s2938_s1 + $0x488] sm:$0xff]  ;;  %v1694_v41 = vpack.c.bf16 %v532_v30, %v531_v28  ;;  %v571_v15 = vld [vmem:[%s2940_s3 + $0x1c0] sm:$0xff]  ;;  %v573_v28 = vld [vmem:[%s2940_s3 + $0x1d0] sm:$0xff] }
  0x4d   :  { %v540_v14 = vld [vmem:[%s2940_s3 + $0xc8] sm:$0xff]  ;;  %v523_v21 = vld [vmem:[%s2940_s3 + $0x40] sm:$0xff]  ;;  %v558_v37 = vld [vmem:[%s2940_s3 + $0x158] sm:$0xff] }
  0x4e   :  { %v572_v16 = vld [vmem:[%s2940_s3 + $0x1c8] sm:$0xff]  ;;  %v1710_v20 = vpack.c.bf16 %v540_v14, %v539_v13  ;;  %v555_v23 = vld [vmem:[%s2940_s3 + $0x140] sm:$0xff] }
  0x4f   :  { %1639 = vmatpush1.bf16.msra.mxu0 %v1638_v35  ;;  %1675 = vmatpush1.bf16.msra.mxu1 %v1674_v39  ;;  %v547_v35 = vld [vmem:[%s2940_s3 + $0x100] sm:$0xff]  ;;  %v1982_v39 = vmov 0.0   ;;  %v1742_v24 = vpack.c.bf16 %v572_v16, %v571_v15  ;;  %v576_v42 = vld [vmem:[%s2940_s3 + $0x1e8] sm:$0xff] }
  0x50   :  { %1641 = vmatprep.subr.bf16.mxu0 %v1640_v36  ;;  %1676 = vmatprep.subr.bf16.mxu1 %v1981_v17  ;;  %v548_v36 = vld [vmem:[%s2940_s3 + $0x108] sm:$0xff]  ;;  %v543_v38 = vld [vmem:[%s2940_s3 + $0xe0] sm:$0xff] }
  0x51   :  { %v1728_v46 = vpack.c.bf16 %v548_v36, %v547_v35  ;;  %v557_v35 = vld [vmem:[%s2940_s3 + $0x150] sm:$0xff]  ;;  %v595_v0 = vld [vmem:[%s2940_s3 + $0x280] sm:$0xff]  ;;  %v596_v1 = vld [vmem:[%s2940_s3 + $0x288] sm:$0xff] }
  0x53   :  { %1643 = vmatpush1.bf16.msra.mxu0 %v1642_v44  ;;  %1678 = vmatpush1.bf16.msra.mxu1 %v1677_v48  ;;  %v1726_v44 = vpack.c.bf16 %v564_v32, %v563_v31  ;;  %v517_v48 = vld [vmem:[%s2940_s3 + $0x10] sm:$0xff] }
  0x54   :  { %1645 = vmatprep.subr.bf16.mxu0 %v1644_v45  ;;  %1679 = vmatprep.subr.bf16.mxu1 %v1981_v17  ;;  %v1696_v45 = vpack.c.bf16 %v516_v34, %v515_v33  ;;  %v525_v33 = vld [vmem:[%s2940_s3 + $0x50] sm:$0xff]  ;;  %v526_v34 = vld [vmem:[%s2940_s3 + $0x58] sm:$0xff] }
  0x55   :  { %v1716_v43 = vpack.c.bf16 %v526_v34, %v525_v33 }
  0x57   :  { %1647 = vmatpush1.bf16.msra.mxu0 %v1646_v53  ;;  %1681 = vmatpush1.bf16.msra.mxu1 %v1680_v57  ;;  %v535_v53 = vld [vmem:[%s2940_s3 + $0xa0] sm:$0xff]  ;;  %v1700_v57 = vpack.c.bf16 %v518_v49, %v517_v48  ;;  %v528_v48 = vld [vmem:[%s2940_s3 + $0x68] sm:$0xff] }
  0x58   :  { %1649 = vmatprep.subr.bf16.mxu0 %v1648_v54  ;;  %1682 = vmatprep.subr.bf16.mxu1 %v1981_v17  ;;  %v536_v54 = vld [vmem:[%s2940_s3 + $0xa8] sm:$0xff]  ;;  %v559_v49 = vld [vmem:[%s2940_s3 + $0x160] sm:$0xff] }
  0x59   :  { %v1702_v59 = vpack.c.bf16 %v536_v54, %v535_v53  ;;  %v545_v53 = vld [vmem:[%s2940_s3 + $0xf0] sm:$0xff]  ;;  %v546_v54 = vld [vmem:[%s2940_s3 + $0xf8] sm:$0xff] }
  0x5b   :  { %1651 = vmatpush1.bf16.msra.mxu0 %v1650_v62  ;;  %1684 = vmatpush1.bf16.msra.mxu1 %v1683_v2  ;;  %v1734_v62 = vpack.c.bf16 %v568_v56, %v567_v55  ;;  %v569_v2 = vld [vmem:[%s2940_s3 + $0x1b0] sm:$0xff]  ;;  %v1722_v56 = vpack.c.bf16 %v546_v54, %v545_v53 }
  0x5c   :  { %1653 = vmatprep.subr.bf16.mxu0 %v1652_v63  ;;  %1685 = vmatprep.subr.bf16.mxu1 %v1981_v17  ;;  %v552_v63 = vld [vmem:[%s2940_s3 + $0x128] sm:$0xff]  ;;  %v1738_v11 = vpack.c.bf16 %v570_v3, %v569_v2  ;;  %v577_v55 = vld [vmem:[%s2940_s3 + $0x1f0] sm:$0xff]  ;;  %v1758_v2 = vpack.c.bf16 %v596_v1, %v595_v0  ;;  %v186_v3 = vlaneseq }
  0x5d   :  { %v1736_v6 = vpack.c.bf16 %v552_v63, %v551_v61  ;;  %v561_v61 = vld [vmem:[%s2940_s3 + $0x170] sm:$0xff]  ;;  %v588_v0 = vld [vmem:[%s2940_s3 + $0x248] sm:$0xff] }
  0x5f   :  { %1655 = vmatpush1.bf16.msra.mxu0 %v1654_v8  ;;  %1687 = vmatpush1.bf16.msra.mxu1 %v1686_v12  ;;  %v521_v8 = vld [vmem:[%s2940_s3 + $0x30] sm:$0xff]  ;;  %v554_v12 = vld [vmem:[%s2940_s3 + $0x138] sm:$0xff] }
  0x60   :  { %1657 = vmatprep.subr.bf16.mxu0 %v1656_v9  ;;  %1688 = vmatprep.subr.bf16.mxu1 %v1981_v17  ;;  %v522_v9 = vld [vmem:[%s2940_s3 + $0x38] sm:$0xff] }
  0x63   :  { %1659 = vmatpush1.bf16.msra.mxu0 %v1658_v18  ;;  %1690 = vmatpush1.bf16.msra.mxu1 %v1689_v22  ;;  %v1708_v18 = vpack.c.bf16 %v522_v9, %v521_v8  ;;  %v524_v22 = vld [vmem:[%s2940_s3 + $0x48] sm:$0xff] }
  0x64   :  { %1661 = vmatprep.subr.bf16.mxu0 %v1660_v19  ;;  %1691 = vmatprep.subr.bf16.mxu1 %v1981_v17  ;;  %v1740_v19 = vpack.c.bf16 %v554_v12, %v553_v10  ;;  %v1712_v30 = vpack.c.bf16 %v524_v22, %v523_v21  ;;  %v580_v21 = vld [vmem:[%s2940_s3 + $0x208] sm:$0xff]  ;;  %v597_v22 = vld [vmem:[%s2940_s3 + $0x290] sm:$0xff] }
  0x67   :  { %1663 = vmatpush1.bf16.msra.mxu0 %v1662_v25  ;;  %1693 = vmatpush1.bf16.msra.mxu1 %v1692_v26  ;;  %v556_v25 = vld [vmem:[%s2940_s3 + $0x148] sm:$0xff]  ;;  %v541_v26 = vld [vmem:[%s2940_s3 + $0xd0] sm:$0xff] }
  0x68   :  { %407 = vmatprep.subr.mxu0 %v182_v27  ;;  %478 = vmatprep.subr.mxu1 %v1982_v39  ;;  %v542_v27 = vld [vmem:[%s2940_s3 + $0xd8] sm:$0xff]  ;;  %v1744_v31 = vpack.c.bf16 %v556_v25, %v555_v23 }
  0x69   :  { %v1714_v32 = vpack.c.bf16 %v542_v27, %v541_v26  ;;  %v598_v26 = vld [vmem:[%s2940_s3 + $0x298] sm:$0xff]  ;;  %v611_v27 = vld [vmem:[%s2940_s3 + $0x300] sm:$0xff] }
  0x6b   :  { %408 = vmatpush1.msra.mxu0 %v181_v29  ;;  %479 = vmatpush1.msra.mxu1 %v183_v40  ;;  %v574_v29 = vld [vmem:[%s2940_s3 + $0x1d8] sm:$0xff]  ;;  %v544_v40 = vld [vmem:[%s2940_s3 + $0xe8] sm:$0xff] }
  0x6c   :  { %432 = vmatmul.mubr.f32.vlgmr.msra.gmra.mrb[2].mxu0 %v2315_v5  ;;  %503 = vmatmul.mubr.f32.vlgmr.msra.gmra.mrb[2].mxu1 %v2315_v5  ;;  %v519_v5 = vld [vmem:[%s2940_s3 + $0x20] sm:$0xff]  ;;  %v1746_v36 = vpack.c.bf16 %v574_v29, %v573_v28  ;;  %v612_v28 = vld [vmem:[%s2940_s3 + $0x308] sm:$0xff] }
  0x6d   :  { %1695 = vmatprep.subr.bf16.mxu0 %v1694_v41  ;;  %1727 = vmatprep.subr.bf16.mxu1 %v1726_v44  ;;  %v1704_v4 = vpack.c.bf16 %v520_v60, %v519_v5  ;;  %v575_v41 = vld [vmem:[%s2940_s3 + $0x1e0] sm:$0xff]  ;;  %v1748_v44 = vpack.c.bf16 %v558_v37, %v557_v35  ;;  %v1762_v35 = vpack.c.bf16 %v598_v26, %v597_v22  ;;  %v582_v37 = vld [vmem:[%s2940_s3 + $0x218] sm:$0xff] }
  0x6e   :  { %1697 = vmatpush3.bf16.msra.mxu0 %v1696_v45  ;;  %1729 = vmatpush3.bf16.msra.mxu1 %v1728_v46  ;;  %v1718_v45 = vpack.c.bf16 %v544_v40, %v543_v38  ;;  %v1750_v46 = vpack.c.bf16 %v576_v42, %v575_v41  ;;  %v1791_v38 = vpack.c.bf16 %v612_v28, %v611_v27  ;;  %v599_v40 = vld [vmem:[%s2940_s3 + $0x2a0] sm:$0xff]  ;;  %v600_v41 = vld [vmem:[%s2940_s3 + $0x2a8] sm:$0xff]  ;;  %v613_v42 = vld [vmem:[%s2940_s3 + $0x310] sm:$0xff] }
  0x6f   :  { %1699 = vmatprep.subr.bf16.mxu0 %v1698_v47  ;;  %1731 = vmatprep.subr.bf16.mxu1 %v1730_v51  ;;  %v527_v47 = vld [vmem:[%s2940_s3 + $0x60] sm:$0xff]  ;;  %v560_v51 = vld [vmem:[%s2940_s3 + $0x168] sm:$0xff]  ;;  %v609_v27 = vld [vmem:[%s2940_s3 + $0x2f0] sm:$0xff] }
  0x70   :  { %v1720_v50 = vpack.c.bf16 %v528_v48, %v527_v47  ;;  %v1752_v52 = vpack.c.bf16 %v560_v51, %v559_v49  ;;  %v584_v47 = vld [vmem:[%s2940_s3 + $0x228] sm:$0xff]  ;;  %v601_v49 = vld [vmem:[%s2940_s3 + $0x2b0] sm:$0xff]  ;;  %v615_v51 = vld [vmem:[%s2940_s3 + $0x320] sm:$0xff] }
  0x71   :  { %v591_v22 = vld [vmem:[%s2940_s3 + $0x260] sm:$0xff]  ;;  %v610_v28 = vld [vmem:[%s2940_s3 + $0x2f8] sm:$0xff] }
  0x72   :  { %1701 = vmatpush3.bf16.msra.mxu0 %v1700_v57  ;;  %1733 = vmatpush3.bf16.msra.mxu1 %v1732_v58  ;;  %v578_v57 = vld [vmem:[%s2940_s3 + $0x1f8] sm:$0xff]  ;;  %v529_v58 = vld [vmem:[%s2940_s3 + $0x70] sm:$0xff] }
  0x73   :  { %1703 = vmatprep.subr.bf16.mxu0 %v1702_v59  ;;  %1735 = vmatprep.subr.bf16.mxu1 %v1734_v62  ;;  %v530_v59 = vld [vmem:[%s2940_s3 + $0x78] sm:$0xff]  ;;  %v1754_v5 = vpack.c.bf16 %v578_v57, %v577_v55  ;;  %v585_v55 = vld [vmem:[%s2940_s3 + $0x230] sm:$0xff] }
  0x74   :  { %v1724_v60 = vpack.c.bf16 %v530_v59, %v529_v58  ;;  %v562_v62 = vld [vmem:[%s2940_s3 + $0x178] sm:$0xff]  ;;  %v603_v58 = vld [vmem:[%s2940_s3 + $0x2c0] sm:$0xff]  ;;  %v604_v59 = vld [vmem:[%s2940_s3 + $0x2c8] sm:$0xff] }
  0x75   :  { %v1756_v63 = vpack.c.bf16 %v562_v62, %v561_v61  ;;  %v1774_v62 = vpack.c.bf16 %v604_v59, %v603_v58  ;;  %v922_v58 = vld [vmem:[#allocation2 + $0x18] sm:$0xff] }
  0x76   :  { %1705 = vmatpush3.bf16.msra.mxu0 %v1704_v4  ;;  %1737 = vmatpush3.bf16.msra.mxu1 %v1736_v6  ;;  %v2700_v4 = vshrl.u32 %v186_v3, 7  ;;  %v606_v3 = vld [vmem:[%s2940_s3 + $0x2d8] sm:$0xff] }
  0x77   :  { %1707 = vmatprep.subr.bf16.mxu0 %v1706_v7  ;;  %1739 = vmatprep.subr.bf16.mxu1 %v1738_v11  ;;  %v2706_v7 = vld [vmem:[%s2939_s2] sm:$0xff] }
  0x78   :  { %v188_v6 = vsub.s32 0, %v2700_v4  ;;  %v196_v8 = vsub.s32 2, %v2700_v4  ;;  %v192_v9 = vsub.s32 1, %v2700_v4  ;;  %v200_v10 = vsub.s32 3, %v2700_v4 }
  0x7a   :  { %1709 = vmatpush3.bf16.msra.mxu0 %v1708_v18  ;;  %1741 = vmatpush3.bf16.msra.mxu1 %v1740_v19  ;;  %v189_v11 = vrot.slane %v2706_v7, %v188_v6  ;;  %v197_v12 = vrot.slane %v2706_v7, %v196_v8  ;;  %v193_v13 = vrot.slane %v2706_v7, %v192_v9  ;;  %v619_v6 = vld [vmem:[%s2940_s3 + $0x340] sm:$0xff]  ;;  %v620_v8 = vld [vmem:[%s2940_s3 + $0x348] sm:$0xff] }
  0x7b   :  { %1711 = vmatprep.subr.bf16.mxu0 %v1710_v20  ;;  %1743 = vmatprep.subr.bf16.mxu1 %v1742_v24  ;;  %v201_v14 = vrot.slane %v2706_v7, %v200_v10  ;;  %v579_v20 = vld [vmem:[%s2940_s3 + $0x200] sm:$0xff] }
  0x7c   :  { %v1760_v33 = vpack.c.bf16 %v580_v21, %v579_v20 }
  0x7e   :  { %1713 = vmatpush3.bf16.msra.mxu0 %v1712_v30  ;;  %1745 = vmatpush3.bf16.msra.mxu1 %v1744_v31 }
  0x7f   :  { %1715 = vmatprep.subr.bf16.mxu0 %v1714_v32  ;;  %1747 = vmatprep.subr.bf16.mxu1 %v1746_v36  ;;  %v581_v36 = vld [vmem:[%s2940_s3 + $0x210] sm:$0xff] }
  0x82   :  { %1717 = vmatpush3.bf16.msra.mxu0 %v1716_v43  ;;  %1749 = vmatpush3.bf16.msra.mxu1 %v1748_v44  ;;  %v614_v43 = vld [vmem:[%s2940_s3 + $0x318] sm:$0xff]  ;;  %v1764_v44 = vpack.c.bf16 %v582_v37, %v581_v36  ;;  %v625_v37 = vld [vmem:[%s2940_s3 + $0x370] sm:$0xff] }
  0x83   :  { %1719 = vmatprep.subr.bf16.mxu0 %v1718_v45  ;;  %1751 = vmatprep.subr.bf16.mxu1 %v1750_v46  ;;  %v1766_v45 = vpack.c.bf16 %v600_v41, %v599_v40  ;;  %v583_v46 = vld [vmem:[%s2940_s3 + $0x220] sm:$0xff]  ;;  %v1794_v48 = vpack.c.bf16 %v614_v43, %v613_v42  ;;  %v204_v42 = vsub.s32 4, %v2700_v4  ;;  %v208_v43 = vsub.s32 5, %v2700_v4 }
  0x84   :  { %v1768_v53 = vpack.c.bf16 %v584_v47, %v583_v46 }
  0x85   :  { %v209_v46 = vrot.slane %v2706_v7, %v208_v43 }
  0x86   :  { %1721 = vmatpush3.bf16.msra.mxu0 %v1720_v50  ;;  %1753 = vmatpush3.bf16.msra.mxu1 %v1752_v52  ;;  %v602_v50 = vld [vmem:[%s2940_s3 + $0x2b8] sm:$0xff]  ;;  %v616_v52 = vld [vmem:[%s2940_s3 + $0x328] sm:$0xff] }
  0x87   :  { %1723 = vmatprep.subr.bf16.mxu0 %v1722_v56  ;;  %1755 = vmatprep.subr.bf16.mxu1 %v1754_v5  ;;  %v1770_v54 = vpack.c.bf16 %v602_v50, %v601_v49  ;;  %v586_v56 = vld [vmem:[%s2940_s3 + $0x238] sm:$0xff]  ;;  %v1797_v57 = vpack.c.bf16 %v616_v52, %v615_v51  ;;  %v617_v5 = vld [vmem:[%s2940_s3 + $0x330] sm:$0xff] }
  0x88   :  { %v1772_v61 = vpack.c.bf16 %v586_v56, %v585_v55 }
  0x8a   :  { %1725 = vmatpush3.bf16.msra.mxu0 %v1724_v60  ;;  %1757 = vmatpush3.bf16.msra.mxu1 %v1756_v63  ;;  %v618_v60 = vld [vmem:[%s2940_s3 + $0x338] sm:$0xff]  ;;  %v587_v63 = vld [vmem:[%s2940_s3 + $0x240] sm:$0xff] }
  0x8b   :  { %1790 = vmatprep.subr.bf16.mxu1 %v1981_v17  ;;  %1759 = vmatprep.subr.bf16.mxu0 %v1758_v2  ;;  %v1800_v1 = vpack.c.bf16 %v618_v60, %v617_v5  ;;  %v605_v2 = vld [vmem:[%s2940_s3 + $0x2d0] sm:$0xff]  ;;  %v1776_v9 = vpack.c.bf16 %v588_v0, %v587_v63  ;;  %v919_v60 = vld [vmem:[#allocation2] sm:$0xff] }
  0x8c   :  { %v1778_v10 = vpack.c.bf16 %v606_v3, %v605_v2  ;;  %v929_v5 = vld [vmem:[#allocation2 + $0x50] sm:$0xff]  ;;  %v934_v2 = vld [vmem:[#allocation2 + $0x78] sm:$0xff] }
  0x8d   :  { %v921_v0 = vld [vmem:[#allocation2 + $0x10] sm:$0xff] }
 0x114   :  { %v291_v15 = vpop.f32.mrb[0].mxu0  ;;  %v362_v18 = vpop.f32.mrb[0].mxu1 }
 0x115   :  { %v2715_v16 = vadd.f32 %v291_v15, %v189_v11  ;;  %v293_v19 = vpop.f32.mrb[1].mxu0  ;;  %v2726_v23 = vadd.f32 %v362_v18, %v197_v12  ;;  %v364_v25 = vpop.f32.mrb[1].mxu1  ;;  %v589_v11 = vld [vmem:[%s2940_s3 + $0x250] sm:$0xff]  ;;  %v590_v12 = vld [vmem:[%s2940_s3 + $0x258] sm:$0xff]  ;;  %v608_v15 = vld [vmem:[%s2940_s3 + $0x2e8] sm:$0xff] }
 0x116   :  { %v2728_v24 = vadd.f32 %v293_v19, %v193_v13  ;;  %v2741_v30 = vadd.f32 %v364_v25, %v201_v14  ;;  %v1803_v13 = vpack.c.bf16 %v620_v8, %v619_v6  ;;  %v607_v14 = vld [vmem:[%s2940_s3 + $0x2e0] sm:$0xff]  ;;  %v621_v18 = vld [vmem:[%s2940_s3 + $0x350] sm:$0xff]  ;;  %v622_v19 = vld [vmem:[%s2940_s3 + $0x358] sm:$0xff]  ;;  %v1780_v20 = vpack.c.bf16 %v590_v12, %v589_v11 }
 0x117   :  { %v508_v29 = vmul.f32 %v2715_v16, %v2715_v16  ;;  %v510_v31 = vmul.f32 %v2726_v23, %v2726_v23  ;;  %v1782_v21 = vpack.c.bf16 %v608_v15, %v607_v14  ;;  %v592_v25 = vld [vmem:[%s2940_s3 + $0x268] sm:$0xff]  ;;  %v1806_v26 = vpack.c.bf16 %v622_v19, %v621_v18  ;;  %v941_v6 = vld [vmem:[#allocation2 + $0xb0] sm:$0xff]  ;;  %v935_v14 = vld [vmem:[#allocation2 + $0x80] sm:$0xff] }
 0x118   :  { %v509_v32 = vmul.f32 %v2728_v24, %v2728_v24  ;;  %v511_v34 = vmul.f32 %v2741_v30, %v2741_v30  ;;  %v936_v8 = vld [vmem:[#allocation2 + $0x88] sm:$0xff]  ;;  %v933_v12 = vld [vmem:[#allocation2 + $0x70] sm:$0xff]  ;;  %v942_v18 = vld [vmem:[#allocation2 + $0xb8] sm:$0xff] }
 0x119   :  { %v948_v19 = vld [vmem:[#allocation2 + $0xe8] sm:$0xff] }
 0x11a   :  { %691 = vmatprep.mubr.f32.mxu0 %v509_v32  ;;  %761 = vmatprep.mubr.f32.mxu1 %v511_v34  ;;  %v1784_v32 = vpack.c.bf16 %v592_v25, %v591_v22  ;;  %v593_v34 = vld [vmem:[%s2940_s3 + $0x270] sm:$0xff]  ;;  %v950_v25 = vld [vmem:[#allocation2 + $0xf8] sm:$0xff] }
 0x11b   :  { %692 = vmatmul.mubr.f32.vlgmr.msra.gmra.mrb[4].mxu0 %v508_v29  ;;  %762 = vmatmul.mubr.f32.vlgmr.msra.gmra.mrb[4].mxu1 %v510_v31  ;;  %v623_v29 = vld [vmem:[%s2940_s3 + $0x360] sm:$0xff]  ;;  %v624_v31 = vld [vmem:[%s2940_s3 + $0x368] sm:$0xff] }
 0x11c   :  { %1761 = vmatpush3.bf16.msra.mxu0 %v1760_v33  ;;  %1792 = vmatpush3.bf16.msra.mxu1 %v1791_v38  ;;  %v1786_v33 = vpack.c.bf16 %v610_v28, %v609_v27  ;;  %v1809_v36 = vpack.c.bf16 %v624_v31, %v623_v29  ;;  %v626_v38 = vld [vmem:[%s2940_s3 + $0x378] sm:$0xff]  ;;  %v947_v27 = vld [vmem:[#allocation2 + $0xe0] sm:$0xff]  ;;  %v949_v31 = vld [vmem:[#allocation2 + $0xf0] sm:$0xff] }
 0x11d   :  { %1763 = vmatprep.subr.bf16.mxu0 %v1762_v35  ;;  %1793 = vmatprep.subr.bf16.mxu1 %v1981_v17  ;;  %v594_v35 = vld [vmem:[%s2940_s3 + $0x278] sm:$0xff]  ;;  %v1812_v41 = vpack.c.bf16 %v626_v38, %v625_v37  ;;  %s1984_s3 = smov [#allocation5]  }
 0x11e   :  { %1510 = vmatprep.mubr.msk.f32.mxu1 %vm1983_vm1, %v1982_v39  ;;  %v1788_v40 = vpack.c.bf16 %v594_v35, %v593_v34  ;;  %v954_v29 = vld [vmem:[#allocation2 + $0x118] sm:$0xff]  ;;  %v969_v35 = vld [vmem:[#allocation2 + $0x190] sm:$0xff]  ;;  %s1324_s14 = sshll.u32 %s1984_s3, 4  ;;  %s1325_s14 = int_to_ptr.vmem [resolvable:$true] %s1324_s14 }
 0x11f   :  { %v962_v34 = vld [vmem:[#allocation2 + $0x158] sm:$0xff]  ;;  %s1952_s1 = scalar_lea.vmem %s1325_s14, 896  ;;  %p1957_p9 = scmp.lt.s32.totalorder %s1325_s14, %s1325_s14 }
 0x120   :  { %1765 = vmatpush3.bf16.msra.mxu0 %v1764_v44  ;;  %1795 = vmatpush3.bf16.msra.mxu1 %v1794_v48  ;;  %v212_v44 = vsub.s32 6, %v2700_v4  ;;  %v1826_v38 = vpack.c.bf16 %v969_v35, %v962_v34  ;;  %p1953_p8 = scmp.ne.s32.totalorder %s1325_s14, %s1952_s1  ;;  %p1958_p10 = scmp.lt.s32.totalorder %s1952_s1, %s1952_s1 }
 0x121   :  { %1767 = vmatprep.subr.bf16.mxu0 %v1766_v45  ;;  %1796 = vmatprep.subr.bf16.mxu1 %v1981_v17  ;;  %v205_v45 = vrot.slane %v2706_v7, %v204_v42  ;;  %v968_v42 = vld [vmem:[#allocation2 + $0x188] sm:$0xff] }
 0x122   :  { %v213_v47 = vrot.slane %v2706_v7, %v212_v44  ;;  %v920_v7 = vld [vmem:[#allocation2 + $0x8] sm:$0xff]  ;;  %v963_v44 = vld [vmem:[#allocation2 + $0x160] sm:$0xff]  ;;  %p1959_p11 = por %p1958_p10, %p1957_p9 }
 0x124   :  { %1769 = vmatpush3.bf16.msra.mxu0 %v1768_v53  ;;  %1798 = vmatpush3.bf16.msra.mxu1 %v1797_v57  ;;  %v927_v57 = vld [vmem:[#allocation2 + $0x40] sm:$0xff]  ;;  %p1960_p12 = pnand %p1959_p11, %p1953_p8 }
 0x125   :  { %1771 = vmatprep.subr.bf16.mxu0 %v1770_v54  ;;  %1799 = vmatprep.subr.bf16.mxu1 %v1981_v17  ;;  %v1814_v59 = vpack.c.bf16 %v927_v57, %v920_v7  ;;  %v977_v7 = vld [vmem:[#allocation2 + $0x1d0] sm:$0xff] }
 0x128   :  { %1773 = vmatpush3.bf16.msra.mxu0 %v1772_v61  ;;  %1801 = vmatpush3.bf16.msra.mxu1 %v1800_v1  ;;  %v926_v61 = vld [vmem:[#allocation2 + $0x38] sm:$0xff]  ;;  %v928_v1 = vld [vmem:[#allocation2 + $0x48] sm:$0xff] }
 0x129   :  { %1775 = vmatprep.subr.bf16.mxu0 %v1774_v62  ;;  %1802 = vmatprep.subr.bf16.mxu1 %v1981_v17  ;;  %v1842_v62 = vpack.c.bf16 %v929_v5, %v922_v58  ;;  %v1816_v63 = vpack.c.bf16 %v926_v61, %v919_v60  ;;  %v1844_v3 = vpack.c.bf16 %v928_v1, %v921_v0  ;;  %v984_v58 = vld [vmem:[#allocation2 + $0x208] sm:$0xff]  ;;  %v997_v5 = vld [vmem:[#allocation2 + $0x270] sm:$0xff]  ;;  %v999_v61 = vld [vmem:[#allocation2 + $0x280] sm:$0xff] }
 0x12a   :  { %v992_v60 = vld [vmem:[#allocation2 + $0x248] sm:$0xff]  ;;  %v989_v1 = vld [vmem:[#allocation2 + $0x230] sm:$0xff] }
 0x12c   :  { %1777 = vmatpush3.bf16.msra.mxu0 %v1776_v9  ;;  %1804 = vmatpush3.bf16.msra.mxu1 %v1803_v13  ;;  %v943_v9 = vld [vmem:[#allocation2 + $0xc0] sm:$0xff]  ;;  %v940_v13 = vld [vmem:[#allocation2 + $0xa8] sm:$0xff] }
 0x12d   :  { %1779 = vmatprep.subr.bf16.mxu0 %v1778_v10  ;;  %1805 = vmatprep.subr.bf16.mxu1 %v1981_v17  ;;  %v1818_v10 = vpack.c.bf16 %v941_v6, %v934_v2  ;;  %v1846_v11 = vpack.c.bf16 %v943_v9, %v936_v8  ;;  %v1820_v15 = vpack.c.bf16 %v940_v13, %v933_v12  ;;  %v996_v2 = vld [vmem:[#allocation2 + $0x268] sm:$0xff]  ;;  %v998_v8 = vld [vmem:[#allocation2 + $0x278] sm:$0xff]  ;;  %v1013_v12 = vld [vmem:[#allocation2 + $0x2f0] sm:$0xff] }
 0x12e   :  { %v1862_v6 = vpack.c.bf16 %v999_v61, %v992_v60  ;;  %v1004_v9 = vld [vmem:[#allocation2 + $0x2a8] sm:$0xff]  ;;  %v1836_v13 = vpack.c.bf16 %v996_v2, %v989_v1 }
 0x12f   :  { %v944_v2 = vld [vmem:[#allocation2 + $0xc8] sm:$0xff] }
 0x130   :  { %1781 = vmatpush3.bf16.msra.mxu0 %v1780_v20  ;;  %1807 = vmatpush3.bf16.msra.mxu1 %v1806_v26  ;;  %v955_v20 = vld [vmem:[#allocation2 + $0x120] sm:$0xff]  ;;  %v957_v26 = vld [vmem:[#allocation2 + $0x130] sm:$0xff] }
 0x131   :  { %1783 = vmatprep.subr.bf16.mxu0 %v1782_v21  ;;  %1808 = vmatprep.subr.bf16.mxu1 %v1981_v17  ;;  %v1848_v21 = vpack.c.bf16 %v942_v18, %v935_v14  ;;  %v1822_v22 = vpack.c.bf16 %v955_v20, %v948_v19  ;;  %v1850_v28 = vpack.c.bf16 %v957_v26, %v950_v25  ;;  %v1003_v18 = vld [vmem:[#allocation2 + $0x2a0] sm:$0xff]  ;;  %v1010_v19 = vld [vmem:[#allocation2 + $0x2d8] sm:$0xff]  ;;  %v1005_v20 = vld [vmem:[#allocation2 + $0x2b0] sm:$0xff] }
 0x132   :  { %v924_v25 = vld [vmem:[#allocation2 + $0x28] sm:$0xff]  ;;  %v931_v26 = vld [vmem:[#allocation2 + $0x60] sm:$0xff] }
 0x134   :  { %1785 = vmatpush3.bf16.msra.mxu0 %v1784_v32  ;;  %1810 = vmatpush3.bf16.msra.mxu1 %v1809_v36  ;;  %v956_v32 = vld [vmem:[#allocation2 + $0x128] sm:$0xff] }
 0x135   :  { %1787 = vmatprep.subr.bf16.mxu0 %v1786_v33  ;;  %1811 = vmatprep.subr.bf16.mxu1 %v1981_v17  ;;  %v1824_v33 = vpack.c.bf16 %v954_v29, %v947_v27  ;;  %v964_v36 = vld [vmem:[#allocation2 + $0x168] sm:$0xff]  ;;  %v1852_v37 = vpack.c.bf16 %v956_v32, %v949_v31  ;;  %v1840_v27 = vpack.c.bf16 %v1010_v19, %v1003_v18  ;;  %v966_v19 = vld [vmem:[#allocation2 + $0x178] sm:$0xff] }
 0x136   :  { %v1870_v29 = vpack.c.bf16 %v931_v26, %v924_v25  ;;  %v960_v18 = vld [vmem:[#allocation2 + $0x148] sm:$0xff]  ;;  %v965_v25 = vld [vmem:[#allocation2 + $0x170] sm:$0xff] }
 0x138   :  { %1789 = vmatpush3.bf16.msra.mxu0 %v1788_v40  ;;  %1813 = vmatpush3.bf16.msra.mxu1 %v1812_v41  ;;  %v971_v40 = vld [vmem:[#allocation2 + $0x1a0] sm:$0xff]  ;;  %v961_v41 = vld [vmem:[#allocation2 + $0x150] sm:$0xff] }
 0x139   :  { %1815 = vmatprep.subr.bf16.mxu0 %v1814_v59  ;;  %1843 = vmatprep.subr.bf16.mxu1 %v1842_v62  ;;  %v1854_v43 = vpack.c.bf16 %v971_v40, %v964_v36  ;;  %v990_v59 = vld [vmem:[#allocation2 + $0x238] sm:$0xff] }
 0x13a   :  { %v1834_v0 = vpack.c.bf16 %v997_v5, %v990_v59  ;;  %v938_v59 = vld [vmem:[#allocation2 + $0x98] sm:$0xff]  ;;  %v945_v5 = vld [vmem:[#allocation2 + $0xd0] sm:$0xff] }
 0x13b   :  { %v1874_v1 = vpack.c.bf16 %v945_v5, %v938_v59 }
 0x13f   :  { %v433_v48 = vpop.f32.mrb[2].mxu0  ;;  %v504_v51 = vpop.f32.mrb[2].mxu1 }
 0x140   :  { %v2884_v49 = vadd.f32 %v433_v48, %v205_v45  ;;  %v435_v50 = vpop.f32.mrb[3].mxu0  ;;  %v2888_v53 = vadd.f32 %v504_v51, %v213_v47  ;;  %v506_v54 = vpop.f32.mrb[3].mxu1  ;;  %v970_v45 = vld [vmem:[#allocation2 + $0x198] sm:$0xff]  ;;  %v983_v47 = vld [vmem:[#allocation2 + $0x200] sm:$0xff]  ;;  %v1828_v51 = vpack.c.bf16 %v968_v42, %v961_v41 }
 0x141   :  { %v2886_v52 = vadd.f32 %v435_v50, %v209_v46  ;;  %v976_v46 = vld [vmem:[#allocation2 + $0x1c8] sm:$0xff]  ;;  %v978_v48 = vld [vmem:[#allocation2 + $0x1d8] sm:$0xff]  ;;  %v985_v50 = vld [vmem:[#allocation2 + $0x210] sm:$0xff]  ;;  %v1856_v54 = vpack.c.bf16 %v970_v45, %v963_v44 }
 0x142   :  { %v514_v55 = vmul.f32 %v2888_v53, %v2888_v53  ;;  %v512_v56 = vmul.f32 %v2884_v49, %v2884_v49  ;;  %v1858_v57 = vpack.c.bf16 %v985_v50, %v978_v48 }
 0x143   :  { %v513_v4 = vmul.f32 %v2886_v52, %v2886_v52 }
 0x144   :  { %1511 = vmatmul.mubr.f32.vlgmr.msra.gmra.mrb[6].mxu1 %v514_v55  ;;  %v975_v55 = vld [vmem:[#allocation2 + $0x1c0] sm:$0xff] }
 0x145   :  { %831 = vmatprep.mubr.f32.mxu0 %v513_v4  ;;  %1156 = vmatprep.mubr.f32.mxu1 %v1982_v39  ;;  %v1830_v4 = vpack.c.bf16 %v983_v47, %v976_v46 }
 0x146   :  { %832 = vmatmul.mubr.f32.vlgmr.msra.gmra.mrb[6].mxu0 %v512_v56  ;;  %1845 = vmatpush1.bf16.msra.mxu1 %v1844_v3  ;;  %v982_v56 = vld [vmem:[#allocation2 + $0x1f8] sm:$0xff]  ;;  %v991_v3 = vld [vmem:[#allocation2 + $0x240] sm:$0xff] }
 0x147   :  { %1085 = vmatprep.mubr.f32.mxu0 %v1982_v39  ;;  %1817 = vmatpush1.bf16.msra.mxu0 %v1816_v63  ;;  %v1832_v62 = vpack.c.bf16 %v982_v56, %v975_v55  ;;  %v1860_v63 = vpack.c.bf16 %v984_v58, %v977_v7  ;;  %v1864_v14 = vpack.c.bf16 %v998_v8, %v991_v3  ;;  %v923_v56 = vld [vmem:[#allocation2 + $0x20] sm:$0xff]  ;;  %v930_v7 = vld [vmem:[#allocation2 + $0x58] sm:$0xff]  ;;  %v932_v58 = vld [vmem:[#allocation2 + $0x68] sm:$0xff] }
 0x148   :  { %1819 = vmatprep.subr.bf16.mxu0 %v1818_v10  ;;  %1847 = vmatprep.subr.bf16.mxu1 %v1846_v11  ;;  %v1011_v10 = vld [vmem:[#allocation2 + $0x2e0] sm:$0xff]  ;;  %v1006_v11 = vld [vmem:[#allocation2 + $0x2b8] sm:$0xff]  ;;  %v1872_v61 = vpack.c.bf16 %v930_v7, %v923_v56  ;;  %v952_v8 = vld [vmem:[#allocation2 + $0x108] sm:$0xff] }
 0x149   :  { %v939_v3 = vld [vmem:[#allocation2 + $0xa0] sm:$0xff]  ;;  %v1014_v7 = vld [vmem:[#allocation2 + $0x2f8] sm:$0xff] }
 0x14a   :  { %1849 = vmatpush1.bf16.msra.mxu1 %v1848_v21  ;;  %v1866_v21 = vpack.c.bf16 %v1013_v12, %v1006_v11  ;;  %v951_v12 = vld [vmem:[#allocation2 + $0x100] sm:$0xff] }
 0x14b   :  { %1821 = vmatpush1.bf16.msra.mxu0 %v1820_v15  ;;  %1851 = vmatprep.subr.bf16.mxu1 %v1850_v28  ;;  %v1838_v15 = vpack.c.bf16 %v1011_v10, %v1004_v9  ;;  %v959_v9 = vld [vmem:[#allocation2 + $0x140] sm:$0xff] }
 0x14c   :  { %1823 = vmatprep.subr.bf16.mxu0 %v1822_v22  ;;  %v1012_v22 = vld [vmem:[#allocation2 + $0x2e8] sm:$0xff] }
 0x14d   :  { %v1868_v28 = vpack.c.bf16 %v1012_v22, %v1005_v20  ;;  %v973_v20 = vld [vmem:[#allocation2 + $0x1b0] sm:$0xff] }
 0x14e   :  { %1853 = vmatpush1.bf16.msra.mxu1 %v1852_v37  ;;  %v1882_v26 = vpack.c.bf16 %v973_v20, %v966_v19 }
 0x14f   :  { %1825 = vmatpush1.bf16.msra.mxu0 %v1824_v33  ;;  %1855 = vmatprep.subr.bf16.mxu1 %v1854_v43 }
 0x150   :  { %1827 = vmatprep.subr.bf16.mxu0 %v1826_v38 }
 0x152   :  { %1857 = vmatpush1.bf16.msra.mxu1 %v1856_v54 }
 0x153   :  { %1829 = vmatpush1.bf16.msra.mxu0 %v1828_v51  ;;  %1859 = vmatprep.subr.bf16.mxu1 %v1858_v57  ;;  %v925_v57 = vld [vmem:[#allocation2 + $0x30] sm:$0xff] }
 0x154   :  { %1831 = vmatprep.subr.bf16.mxu0 %v1830_v4 }
 0x156   :  { %1861 = vmatpush1.bf16.msra.mxu1 %v1860_v63  ;;  %v937_v63 = vld [vmem:[#allocation2 + $0x90] sm:$0xff] }
 0x157   :  { %1833 = vmatpush1.bf16.msra.mxu0 %v1832_v62  ;;  %1863 = vmatprep.subr.bf16.mxu1 %v1862_v6  ;;  %v1899_v62 = vpack.c.bf16 %v932_v58, %v925_v57  ;;  %v946_v6 = vld [vmem:[#allocation2 + $0xd8] sm:$0xff]  ;;  %v1876_v10 = vpack.c.bf16 %v944_v2, %v937_v63  ;;  %v1009_v57 = vld [vmem:[#allocation2 + $0x2d0] sm:$0xff]  ;;  %v1016_v58 = vld [vmem:[#allocation2 + $0x308] sm:$0xff] }
 0x158   :  { %1835 = vmatprep.subr.bf16.mxu0 %v1834_v0  ;;  %v1902_v11 = vpack.c.bf16 %v946_v6, %v939_v3  ;;  %v1917_v5 = vpack.c.bf16 %v1016_v58, %v1009_v57 }
 0x15a   :  { %1865 = vmatpush1.bf16.msra.mxu1 %v1864_v14  ;;  %v958_v14 = vld [vmem:[#allocation2 + $0x138] sm:$0xff] }
 0x15b   :  { %1837 = vmatpush1.bf16.msra.mxu0 %v1836_v13  ;;  %1867 = vmatprep.subr.bf16.mxu1 %v1866_v21  ;;  %v1878_v13 = vpack.c.bf16 %v959_v9, %v952_v8  ;;  %v1880_v21 = vpack.c.bf16 %v958_v14, %v951_v12 }
 0x15c   :  { %1839 = vmatprep.subr.bf16.mxu0 %v1838_v15  ;;  %v953_v15 = vld [vmem:[#allocation2 + $0x110] sm:$0xff] }
 0x15d   :  { %v1905_v22 = vpack.c.bf16 %v960_v18, %v953_v15 }
 0x15e   :  { %1869 = vmatpush1.bf16.msra.mxu1 %v1868_v28  ;;  %v967_v28 = vld [vmem:[#allocation2 + $0x180] sm:$0xff] }
 0x15f   :  { %1841 = vmatpush1.bf16.msra.mxu0 %v1840_v27  ;;  %1898 = vmatprep.subr.bf16.mxu1 %v1981_v17  ;;  %v972_v27 = vld [vmem:[#allocation2 + $0x1a8] sm:$0xff] }
 0x160   :  { %1871 = vmatprep.subr.bf16.mxu0 %v1870_v29  ;;  %v974_v29 = vld [vmem:[#allocation2 + $0x1b8] sm:$0xff] }
 0x1ee   :  { %v1373_v31 = vpop.f32.mrb[4].mxu0  ;;  %v1408_v32 = vpop.f32.mrb[4].mxu1 }
 0x1ef   :  { %v1374_v33 = vpop.f32.mrb[5].mxu0  ;;  %v1409_v35 = vpop.f32.mrb[5].mxu1 }
 0x1f0   :  { %v1375_v34 = vadd.f32 %v1374_v33, %v1373_v31  ;;  %v1410_v36 = vadd.f32 %v1409_v35, %v1408_v32  ;;  %v980_v31 = vld [vmem:[#allocation2 + $0x1e8] sm:$0xff]  ;;  %v987_v32 = vld [vmem:[#allocation2 + $0x220] sm:$0xff]  ;;  %v1884_v33 = vpack.c.bf16 %v972_v27, %v965_v25 }
 0x1f1   :  { %v979_v35 = vld [vmem:[#allocation2 + $0x1e0] sm:$0xff] }
 0x1f2   :  { %v764_v37 = vadd.f32 %v1410_v36, %v1375_v34  ;;  %v1908_v34 = vpack.c.bf16 %v974_v29, %v967_v28  ;;  %v986_v36 = vld [vmem:[#allocation2 + $0x218] sm:$0xff] }
 0x217   :  { %v903_v38 = vpop.f32.mrb[6].mxu1 }
 0x218   :  { %v1512_v41 = vpop.f32.mrb[7].mxu1 }
 0x219   :  { %v1443_v40 = vpop.f32.mrb[6].mxu0  ;;  %v1001_v41 = vld [vmem:[#allocation2 + $0x290] sm:$0xff] }
 0x21a   :  { %v1444_v42 = vpop.f32.mrb[7].mxu0 }
 0x21b   :  { %v1445_v43 = vadd.f32 %v1444_v42, %v1443_v40  ;;  %v994_v40 = vld [vmem:[#allocation2 + $0x258] sm:$0xff]  ;;  %v1888_v42 = vpack.c.bf16 %v986_v36, %v979_v35 }
 0x21d   :  { %v834_v44 = vadd.f32 %v1445_v43, %v764_v37  ;;  %v981_v37 = vld [vmem:[#allocation2 + $0x1f0] sm:$0xff] }
 0x21f   :  { %v904_v45 = vadd.f32 %v903_v38, %v834_v44  ;;  %v988_v38 = vld [vmem:[#allocation2 + $0x228] sm:$0xff]  ;;  %v993_v44 = vld [vmem:[#allocation2 + $0x250] sm:$0xff] }
 0x220   :  { %v1911_v43 = vpack.c.bf16 %v988_v38, %v981_v37 }
 0x221   :  { %1926 = vrsqrt.f32 %v904_v45  ;;  %vm909_vm2 = vcmp.eq.f32.partialorder %v904_v45, inf  ;;  %v912_v48 = vand.u32 2147483648, %v904_v45  ;;  %vm911_vm3 = vcmp.eq.f32.partialorder %v904_v45, 0.0 }
 0x222   :  { %v914_v54 = vadd.f32 1.0, %v904_v45 }
 0x22b   :  { %v1927_v46 = vpop.eup %1926 }
 0x22c   :  { %v908_v47 = vmul.f32 %v1927_v46, %v904_v45  ;;  %v1000_v46 = vld [vmem:[#allocation2 + $0x288] sm:$0xff] }
 0x22e   :  { %v910_v50 = vsel %vm909_vm2, %v904_v45, %v908_v47  ;;  %v995_v47 = vld [vmem:[#allocation2 + $0x260] sm:$0xff] }
 0x22f   :  { %v913_v51 = vsel %vm911_vm3, %v912_v48, %v910_v50  ;;  %v1002_v48 = vld [vmem:[#allocation2 + $0x298] sm:$0xff]  ;;  %v1008_v50 = vld [vmem:[#allocation2 + $0x2c8] sm:$0xff] }
 0x230   :  { %v915_v4 = vadd.f32 1e-08, %v913_v51  ;;  %v1015_v51 = vld [vmem:[#allocation2 + $0x300] sm:$0xff] }
 0x231   :  { %v1894_v56 = vpack.c.bf16 %v1015_v51, %v1008_v50 }
 0x232   :  { %v916_v55 = vmul.f32 %v915_v4, %v914_v54  ;;  %v1892_v54 = vpack.c.bf16 %v1000_v46, %v993_v44  ;;  %v1914_v4 = vpack.c.bf16 %v1002_v48, %v995_v47 }
 0x234   :  { %1928 = vrcp.f32 %v916_v55  ;;  %v1007_v55 = vld [vmem:[#allocation2 + $0x2c0] sm:$0xff] }
 0x235   :  { %v1896_v59 = vpack.c.bf16 %v1014_v7, %v1007_v55 }
 0x23e   :  { %v1929_v60 = vpop.eup %1928 }
 0x23f   :  { %v2899_v0 = vmul.f32 %v1929_v60, %v904_v45  ;;  %v1890_v45 = vpack.c.bf16 %v1001_v41, %v994_v40 }
 0x241   :  { %1337 = vmatmul.mubr.msk.f32.vlgmr.msra.gmra.mrb[8].mxu0 %vm1017_vm4, %v2899_v0  ;;  %1338 = vmatmul.mubr.msk.f32.vlgmr.msra.gmra.mrb[8].mxu1 %vm1017_vm4, %v2899_v0 }
 0x242   :  { %1873 = vmatpush1.bf16.msra.mxu0 %v1872_v61  ;;  %1900 = vmatpush3.bf16.msra.mxu1 %v1899_v62 }
 0x243   :  { %1875 = vmatprep.subr.bf16.mxu0 %v1874_v1  ;;  %1901 = vmatprep.subr.bf16.mxu1 %v1981_v17 }
 0x244   :  { %1227 = vmatprep.mubr.f32.mxu0 %v1982_v39  ;;  %1541 = vmatprep.mubr.msk.f32.mxu1 %vm1983_vm1, %v1982_v39  ;;  %v1886_v39 = vpack.c.bf16 %v987_v32, %v980_v31 }
 0x246   :  { %1877 = vmatpush1.bf16.msra.mxu0 %v1876_v10  ;;  %1903 = vmatpush3.bf16.msra.mxu1 %v1902_v11 }
 0x247   :  { %1879 = vmatprep.subr.bf16.mxu0 %v1878_v13  ;;  %1904 = vmatprep.subr.bf16.mxu1 %v1981_v17 }
 0x24a   :  { %1881 = vmatpush1.bf16.msra.mxu0 %v1880_v21  ;;  %1906 = vmatpush3.bf16.msra.mxu1 %v1905_v22 }
 0x24b   :  { %1883 = vmatprep.subr.bf16.mxu0 %v1882_v26  ;;  %1907 = vmatprep.subr.bf16.mxu1 %v1981_v17 }
 0x24e   :  { %1885 = vmatpush1.bf16.msra.mxu0 %v1884_v33  ;;  %1909 = vmatpush3.bf16.msra.mxu1 %v1908_v34 }
 0x24f   :  { %1887 = vmatprep.subr.bf16.mxu0 %v1886_v39  ;;  %1910 = vmatprep.subr.bf16.mxu1 %v1981_v17 }
 0x252   :  { %1889 = vmatpush1.bf16.msra.mxu0 %v1888_v42  ;;  %1912 = vmatpush3.bf16.msra.mxu1 %v1911_v43 }
 0x253   :  { %1891 = vmatprep.subr.bf16.mxu0 %v1890_v45  ;;  %1913 = vmatprep.subr.bf16.mxu1 %v1981_v17 }
 0x256   :  { %1893 = vmatpush1.bf16.msra.mxu0 %v1892_v54  ;;  %1915 = vmatpush3.bf16.msra.mxu1 %v1914_v4 }
 0x257   :  { %1895 = vmatprep.subr.bf16.mxu0 %v1894_v56  ;;  %1916 = vmatprep.subr.bf16.mxu1 %v1981_v17 }
 0x25a   :  { %1897 = vmatpush1.bf16.msra.mxu0 %v1896_v59  ;;  %1918 = vmatpush3.bf16.msra.mxu1 %v1917_v5 }
 0x25d   :  { %1339 = vmatmul.mubr.msk.f32.vlgmr.msra.gmra.mrb[10].mxu0 %vm1017_vm4, %v2899_v0  ;;  %1542 = vmatmul.mubr.msk.f32.vlgmr.msra.gmra.mrb[10].mxu1 %vm1017_vm4, %v2899_v0 }
 0x314   :  { %v1087_v60 = vpop.f32.mrb[8].mxu0  ;;  %v1158_v61 = vpop.f32.mrb[8].mxu1 }
 0x315   :  { %v1304_v62 = vmul.f32 %v1087_v60, %v2715_v16  ;;  %v1306_v63 = vmul.f32 %v1158_v61, %v2726_v23  ;;  %v1089_v1 = vpop.f32.mrb[9].mxu0  ;;  %v1160_v2 = vpop.f32.mrb[9].mxu1 }
 0x316   :  { %v1305_v3 = vmul.f32 %v1089_v1, %v2728_v24  ;;  %v1307_v17 = vmul.f32 %v1160_v2, %v2741_v30 }
 0x317   :  { %1311 = vst [vmem:[#allocation5] sm:$0xff] %v1304_v62  ;;  %1313 = vst [vmem:[#allocation5 + $0x10] sm:$0xff] %v1306_v63 }
 0x318   :  { %1312 = vst [vmem:[#allocation5 + $0x8] sm:$0xff] %v1305_v3  ;;  %1314 = vst [vmem:[#allocation5 + $0x18] sm:$0xff] %v1307_v17 }
 0x330   :  { %v1229_v6 = vpop.f32.mrb[10].mxu0  ;;  %v1300_v0 = vpop.f32.mrb[10].mxu1 }
 0x331   :  { %v1308_v8 = vmul.f32 %v1229_v6, %v2884_v49  ;;  %v1310_v16 = vmul.f32 %v1300_v0, %v2888_v53  ;;  %v1231_v9 = vpop.f32.mrb[11].mxu0  ;;  %v1543_v23 = vpop.f32.mrb[11].mxu1 }
 0x332   :  { %v1309_v10 = vmul.f32 %v1231_v9, %v2886_v52 }
 0x333   :  { %1315 = vst [vmem:[#allocation5 + $0x20] sm:$0xff] %v1308_v8  ;;  %1317 = vst [vmem:[#allocation5 + $0x30] sm:$0xff] %v1310_v16 }
 0x334   :  { %1316 = vst [vmem:[#allocation5 + $0x28] sm:$0xff] %v1309_v10 }
 0x335   :  { %1963 = shalt.err (!%p1960_p12)
}
 0x336   :  { %s1964_s16 = scalar_lea.hbm %s2942_s5, 896 }
 0x337   :  { %p1965_p13 = scmp.ne.s32.totalorder %s2942_s5, %s1964_s16  ;;  %p1968_p0 = scmp.lt.u32.totalorder %s1964_s16, %s2942_s5 }
 0x339   :  { %p1970_p1 = pnand %p1968_p0, %p1965_p13 }
 0x33b   :  { %1973 = shalt.err (!%p1970_p1)
}
 0x33c   :  { %1327 = dma.vmem_to_hbm [thread:$0]  %s1325_s14, 896, %s2942_s5, [#allocation4]  }
 0x33d   :  { %1976 = dma.done.wait [#allocation4], 896  }
 0x33e   :  { %1977 = vsyncadd [#allocation4], 4294966400 }
 0x33f   :  { %1331 = vsyncpa [#allocation3], 1 }
 0x340   :  { %1332 = vsyncpa [#allocation4], 1 }

</bundles_post_ra>
